<compile_context>
chip_gen: v6e
topology: v6e:2x2x1
jax: 0.10.0
libtpu: 0.0.40
codegen_flags: <defaults>
</compile_context>

<pallas_src>
import math

import jax
import jax.numpy as jnp
from jax import lax
from jax.experimental import pallas as pl
from jax.experimental.pallas import tpu as pltpu

HEADS = 4
D_MODEL = 32
D_K = D_MODEL // HEADS          # 8
SEQ = 8
BATCH = 2
N_ROWS = BATCH * SEQ            # 16 : rows of every lane-dense slab, row n = (b, i)
HS = HEADS * SEQ                # 32 : per-batch score width (h, j)
COLS = BATCH * HS               # 64 : lane-dense score width, col c = (b_col, h, j)

# ---- packed-parameter slab layout (width = 4*D_MODEL = 128) ------------------
PW1 = 0                          # rows [0,128)  : block-diag(wq/sqrt(dk), wk, wv, wp)
PWO = PW1 + 4 * D_MODEL          # rows [128,160): wo in cols [0,32)
PBQ = PWO + D_MODEL              # row 160       : [bq/sqrt(dk) | bk | bv | 0]
PUV = PBQ + 1                    # row 161       : [u/sqrt(dk) | v/sqrt(dk) | bo | 0]
P_ROWS = 168                     # padded to a multiple of 8

# ---- constant slab layout (width = COLS = 64) --------------------------------
CREP = 0                         # rows [0,64)   : (64,16) row-replication matrix
CBLK = CREP + COLS               # rows [64,128) : (64,32) head block-diagonal selector
CGRP = CBLK + COLS               # rows [128,192): (64,64) same-8-block indicator
CINB = CGRP + COLS               # rows [192,208): (16,64) in-batch block indicator
C_ROWS = CINB + N_ROWS           # 208


# ------------------------------------------------------------------------------
# Fused kernel: packed projections -> scores -> rel_shift (rolls) -> masked
# per-head softmax -> attn @ v -> output projection.
# ------------------------------------------------------------------------------
def _rel_mha_kernel(x_ref, mask_ref, pslab_ref, cslab_ref, out_ref, attn_ref):
    f32 = jnp.float32
    neg = jnp.float32(-(2.0 ** 15))
    D, S = D_MODEL, SEQ

    # ---- static slab slices (weights / biases / constants) ----
    w1 = pslab_ref[PW1:PW1 + 4 * D, :]            # (128,128) block-diag proj weights
    wo = pslab_ref[PWO:PWO + D, 0:D]              # (32,32)
    bqkvp = pslab_ref[PBQ:PBQ + 1, :]             # (1,128)  [bq*s | bk | bv | 0]
    uvbo = pslab_ref[PUV:PUV + 1, :]              # (1,128)  [u*s | v*s | bo | 0]
    u_b = uvbo[:, 0:D]
    v_b = uvbo[:, D:2 * D]
    b_o = uvbo[:, 2 * D:3 * D]

    rep = cslab_ref[CREP:CREP + COLS, 0:N_ROWS]   # (64,16) row replication
    blk = cslab_ref[CBLK:CBLK + COLS, 0:D]        # (64,32) head block-diag selector
    grp = cslab_ref[CGRP:CGRP + COLS, 0:COLS]     # (64,64) same-8-block indicator
    inb = cslab_ref[CINB:CINB + N_ROWS, 0:COLS]   # (16,64) in-batch indicator

    # ---- fused q/k/v/pos projections: one 128-lane matmul (wq, bq pre-scaled) ----
    proj = jnp.dot(x_ref[...], w1, preferred_element_type=f32) + bqkvp     # (16,128)
    qp = proj[:, 0:D]                                                      # (16,32)
    kvp = proj[:, D:4 * D]                                                 # (16,96)

    # replicate k/v/pos rows into (b_col, h, j) order (one matmul), head-block mask
    kvp_rep = jnp.dot(rep, kvp, preferred_element_type=f32)                # (64,96)
    k_bblk = kvp_rep[:, 0:D] * blk                                         # (64,32)
    v_bblk = kvp_rep[:, D:2 * D] * blk
    p_bblk = kvp_rep[:, 2 * D:3 * D] * blk

    q_u = qp + u_b                                                         # (16,32)
    q_v = qp + v_b

    ctr = (((1,), (1,)), ((), ()))
    ac = lax.dot_general(q_u, k_bblk, ctr, preferred_element_type=f32)     # (16,64)
    bd = lax.dot_general(q_v, p_bblk, ctr, preferred_element_type=f32)     # (16,64)

    # ---- rel_shift in the lane-dense (16,64) layout ----
    # out[i, j] = bd[i, j + (S-1-i)]   for j <= i
    #           = 0                    for j == i+1
    #           = bd[i+1, j - (i+2)]   for j >  i+1
    # Selected lanes never cross a head block, so circular rolls are exact here.
    jj = lax.broadcasted_iota(jnp.int32, (N_ROWS, COLS), 1) % S            # j within head
    ii = lax.broadcasted_iota(jnp.int32, (N_ROWS, COLS), 0) % S            # i within batch
    bd_up = pltpu.roll(bd, shift=N_ROWS - 1, axis=0)                       # row n -> n+1
    bd_shift = jnp.zeros((N_ROWS, COLS), f32)
    for i in range(S):
        sh_a = (i - (S - 1)) % COLS                                        # pull c+(S-1-i)
        a = bd if sh_a == 0 else pltpu.roll(bd, shift=sh_a, axis=1)
        if i + 2 <= S - 1:
            b = pltpu.roll(bd_up, shift=i + 2, axis=1)                     # pull c-(i+2)
            val = jnp.where(jj <= i, a, jnp.where(jj == i + 1, 0.0, b))
        else:
            val = jnp.where(jj <= i, a, 0.0)                               # j>i+1 impossible
        bd_shift = jnp.where(ii == i, val, bd_shift)

    # ---- masked, per-head softmax (scores already carry the 1/sqrt(d_k) scale) ----
    mask_big = jnp.concatenate([mask_ref[...]] * (BATCH * HEADS), axis=1)  # (16,64)
    scores = jnp.where(mask_big == 0, neg, ac + bd_shift)

    # per-8-block max via butterfly rolls (XLU) + matmul broadcast (idle MXU)
    m = jnp.maximum(scores, pltpu.roll(scores, shift=COLS - 4, axis=1))
    m = jnp.maximum(m, pltpu.roll(m, shift=COLS - 2, axis=1))
    m = jnp.maximum(m, pltpu.roll(m, shift=COLS - 1, axis=1))
    m_sel = jnp.where(jj == 0, m, 0.0)
    m_bcast = jnp.dot(m_sel, grp, preferred_element_type=f32)              # block-constant

    e = jnp.exp(scores - m_bcast)
    denom = jnp.dot(e, grp, preferred_element_type=f32)                    # per-block sums
    attn = (e * pl.reciprocal(denom, approx=False)) * inb                  # zero cross-batch
    attn_ref[...] = attn

    # TODO(synk): attention dropout skipped (eval mode).

    # ---- context (head-concat comes out directly) + output projection ----
    ctx = jnp.dot(attn, v_bblk, preferred_element_type=f32)                # (16,32)
    out_ref[...] = jnp.dot(ctx, wo, preferred_element_type=f32) + b_o


# ------------------------------------------------------------------------------
# Wrapper: single grid step, whole problem resident in VMEM (<1 MiB working set).
# ------------------------------------------------------------------------------
def relative_mha(q, k, v, pos_emb, mask, packed):
    bs, S, D = q.shape
    f32 = jnp.float32

    # layout plumbing only: pack q|k|v|pos into one lane-dense (bs*S, 4*D) slab
    q2 = q.reshape(bs * S, D)
    k2 = k.reshape(bs * S, D)
    v2 = v.reshape(bs * S, D)
    pos2 = pos_emb[0]
    pos_t = jnp.concatenate([pos2] * bs, axis=0)                 # (bs*S, D)
    x = jnp.concatenate([q2, k2, v2, pos_t], axis=-1).astype(f32)  # (16,128)
    mask2 = mask.reshape(bs * S, S).astype(jnp.int32)            # (16,8)

    def full2(shape):
        return pl.BlockSpec(shape, lambda i: (0, 0))

    out2, attn_full = pl.pallas_call(
        _rel_mha_kernel,
        out_shape=(jax.ShapeDtypeStruct((bs * S, D), f32),
                   jax.ShapeDtypeStruct((bs * S, bs * HEADS * S), f32)),
        grid_spec=pltpu.PrefetchScalarGridSpec(
            num_scalar_prefetch=0,
            grid=(1,),
            in_specs=[full2((bs * S, 4 * D)),
                      full2((bs * S, S)),
                      full2((P_ROWS, 4 * D_MODEL)),
                      full2((C_ROWS, COLS))],
            out_specs=[full2((bs * S, D)),
                       full2((bs * S, bs * HEADS * S))]),
        compiler_params=pltpu.CompilerParams(dimension_semantics=("arbitrary",)),
    )(x, mask2, packed["pslab"], packed["cslab"])

    out = out2.reshape(bs, S, D)
    # extract in-batch blocks: (bs*S, bs*H*S) -> (bs, H, S, S)  (layout plumbing only)
    a5 = attn_full.reshape(bs, S, bs, HEADS, S)
    attn = jnp.stack([a5[b, :, b] for b in range(bs)], axis=0)   # (bs, S, H, S)
    attn = attn.transpose(0, 2, 1, 3)
    return out, attn


# ------------------------------------------------------------------------------
# One-time parameter packing (scale folding + block-diag weight + constant masks).
# ------------------------------------------------------------------------------
def pack_params(p):
    f32 = jnp.float32
    s = 1.0 / math.sqrt(D_K)
    D = D_MODEL

    w1 = jnp.zeros((4 * D, 4 * D), f32)
    w1 = w1.at[0 * D:1 * D, 0 * D:1 * D].set(p["wq"] * s)
    w1 = w1.at[1 * D:2 * D, 1 * D:2 * D].set(p["wk"])
    w1 = w1.at[2 * D:3 * D, 2 * D:3 * D].set(p["wv"])
    w1 = w1.at[3 * D:4 * D, 3 * D:4 * D].set(p["wp"])

    bqkvp = jnp.concatenate([p["bq"][0] * s, p["bk"][0], p["bv"][0],
                             jnp.zeros((D,), f32)])
    uvbo = jnp.concatenate([p["pos_bias_u"][0] * s, p["pos_bias_v"][0] * s,
                            p["bo"][0], jnp.zeros((D,), f32)])

    pslab = jnp.zeros((P_ROWS, 4 * D), f32)
    pslab = pslab.at[PW1:PW1 + 4 * D, :].set(w1)
    pslab = pslab.at[PWO:PWO + D, 0:D].set(p["wo"])
    pslab = pslab.at[PBQ, :].set(bqkvp)
    pslab = pslab.at[PUV, :].set(uvbo)

    r = jnp.arange(COLS)
    rep = (jnp.arange(N_ROWS)[None, :] ==
           ((r // HS) * SEQ + (r % SEQ))[:, None]).astype(f32)              # (64,16)
    blk = (((r % HS) // SEQ)[:, None] ==
           (jnp.arange(D) // D_K)[None, :]).astype(f32)                     # (64,32)
    grp = ((r // SEQ)[:, None] == (r // SEQ)[None, :]).astype(f32)          # (64,64)
    inb = ((jnp.arange(N_ROWS) // SEQ)[:, None] ==
           (r // HS)[None, :]).astype(f32)                                  # (16,64)

    cslab = jnp.zeros((C_ROWS, COLS), f32)
    cslab = cslab.at[CREP:CREP + COLS, 0:N_ROWS].set(rep)
    cslab = cslab.at[CBLK:CBLK + COLS, 0:D].set(blk)
    cslab = cslab.at[CGRP:CGRP + COLS, 0:COLS].set(grp)
    cslab = cslab.at[CINB:CINB + N_ROWS, 0:COLS].set(inb)

    return {"pslab": pslab, "cslab": cslab}


# ------------------------------------------------------------------------------
# Deterministic synthetic parameters + pure-JAX reference for verification.
# ------------------------------------------------------------------------------
def init_params(key):
    ks = jax.random.split(key, 11)
    scale = 0.1

    def lin(kw, kb):
        w = jax.random.normal(kw, (D_MODEL, D_MODEL), jnp.float32) * scale
        b = jax.random.normal(kb, (1, D_MODEL), jnp.float32) * scale
        return w, b

    wq, bq = lin(ks[0], ks[1])
    wk, bk = lin(ks[2], ks[3])
    wv, bv = lin(ks[4], ks[5])
    wo, bo = lin(ks[6], ks[7])
    wp = jax.random.normal(ks[8], (D_MODEL, D_MODEL), jnp.float32) * scale
    pos_bias_u = (jax.random.normal(ks[9], (HEADS, D_K), jnp.float32) * scale
                  ).reshape(1, D_MODEL)
    pos_bias_v = (jax.random.normal(ks[10], (HEADS, D_K), jnp.float32) * scale
                  ).reshape(1, D_MODEL)
    return dict(wq=wq, bq=bq, wk=wk, bk=bk, wv=wv, bv=bv, wp=wp,
                wo=wo, bo=bo, pos_bias_u=pos_bias_u, pos_bias_v=pos_bias_v)


def rel_shift(x):
    b, h, s, p = x.shape
    zero_pad = jnp.zeros((b, h, s, 1), x.dtype)
    x_padded = jnp.concatenate([zero_pad, x], axis=-1)
    x_padded = x_padded.reshape(b, h, p + 1, s)
    return x_padded[:, :, 1:, :].reshape(b, h, s, p)


def reference(q, k, v, pos_emb, mask, p):
    bs, S, D = q.shape
    kp = (k @ p["wk"] + p["bk"]).reshape(bs, S, HEADS, D_K).transpose(0, 2, 1, 3)
    qp = (q @ p["wq"] + p["bq"]).reshape(bs, S, HEADS, D_K)
    vp = (v @ p["wv"] + p["bv"]).reshape(bs, S, HEADS, D_K).transpose(0, 2, 1, 3)
    pp = (pos_emb @ p["wp"]).reshape(1, S, HEADS, D_K).transpose(0, 2, 1, 3)[0]
    u = p["pos_bias_u"].reshape(HEADS, D_K)
    vb = p["pos_bias_v"].reshape(HEADS, D_K)
    q_u = (qp + u).transpose(0, 2, 1, 3)
    q_v = (qp + vb).transpose(0, 2, 1, 3)
    ac = jnp.einsum("bhqd,bhkd->bhqk", q_u, kp)
    bd = jnp.einsum("bhqd,hkd->bhqk", q_v, pp)
    bd = rel_shift(bd)
    scores = (ac + bd) / math.sqrt(D_K)
    scores = jnp.where(mask[:, None, :, :] == 0, jnp.float32(-(2.0 ** 15)), scores)
    attn = jax.nn.softmax(scores, axis=-1)
    ctx = jnp.einsum("bhqk,bhkd->bhqd", attn, vp)
    concat = ctx.transpose(0, 2, 1, 3).reshape(bs, S, D)
    out = concat @ p["wo"] + p["bo"]
    return out, attn


if __name__ == "__main__":
    key = jax.random.PRNGKey(0)
    kq, kk, kv, kpos, kparam = jax.random.split(key, 5)
    q = jax.random.normal(kq, (BATCH, SEQ, D_MODEL), jnp.float32)
    k = jax.random.normal(kk, (BATCH, SEQ, D_MODEL), jnp.float32)
    v = jax.random.normal(kv, (BATCH, SEQ, D_MODEL), jnp.float32)
    pos_emb = jax.random.normal(kpos, (1, SEQ, D_MODEL), jnp.float32)
    mask = jnp.broadcast_to(jnp.tril(jnp.ones((SEQ, SEQ), jnp.int32)),
                            (BATCH, SEQ, SEQ))
    params = init_params(kparam)
    packed = pack_params(params)           # one-time parameter transform

    out, attn = jax.jit(relative_mha)(q, k, v, pos_emb, mask, packed)
    jax.block_until_ready((out, attn))

    ref_out, ref_attn = reference(q, k, v, pos_emb, mask, params)
    assert out.shape == (BATCH, SEQ, D_MODEL)
    assert attn.shape == (BATCH, HEADS, SEQ, SEQ)
    assert jnp.allclose(out, ref_out, atol=1e-3, rtol=1e-3)
    assert jnp.allclose(attn, ref_attn, atol=1e-3, rtol=1e-3)
    print("KERNEL_OK")
</pallas_src>

<mosaic_0001>
module attributes {stable_mosaic.version = 11 : i64} {
  func.func @_rel_mha_kernel(%arg0: i32, %arg1: memref<16x128xf32, #tpu.memory_space<vmem>>, %arg2: memref<16x8xi32, #tpu.memory_space<vmem>>, %arg3: memref<168x128xf32, #tpu.memory_space<vmem>>, %arg4: memref<208x64xf32, #tpu.memory_space<vmem>>, %arg5: memref<16x32xf32, #tpu.memory_space<vmem>>, %arg6: memref<16x64xf32, #tpu.memory_space<vmem>>) attributes {dimension_semantics = [#tpu.dimension_semantics<arbitrary>], iteration_bounds = array<i64: 1>, scalar_prefetch = 0 : i64, scratch_operands = 0 : i64, tpu.core_type = #tpu.core_type<tc>, window_params = [{pipeline_mode = #tpu.pipeline_mode<synchronous>, transform_indices = @transform_0, window_bounds = array<i64: 16, 128>}, {pipeline_mode = #tpu.pipeline_mode<synchronous>, transform_indices = @transform_1, window_bounds = array<i64: 16, 8>}, {pipeline_mode = #tpu.pipeline_mode<synchronous>, transform_indices = @transform_2, window_bounds = array<i64: 168, 128>}, {pipeline_mode = #tpu.pipeline_mode<synchronous>, transform_indices = @transform_3, window_bounds = array<i64: 208, 64>}, {pipeline_mode = #tpu.pipeline_mode<synchronous>, transform_indices = @transform_4, window_bounds = array<i64: 16, 32>}, {pipeline_mode = #tpu.pipeline_mode<synchronous>, transform_indices = @transform_5, window_bounds = array<i64: 16, 64>}]} {
    %c0 = arith.constant 0 : index
    %c0_0 = arith.constant 0 : index
    %0 = vector.load %arg3[%c0, %c0_0] : memref<168x128xf32, #tpu.memory_space<vmem>>, vector<128x128xf32>
    %c128 = arith.constant 128 : index
    %c0_1 = arith.constant 0 : index
    %1 = vector.load %arg3[%c128, %c0_1] : memref<168x128xf32, #tpu.memory_space<vmem>>, vector<32x32xf32>
    %c160 = arith.constant 160 : index
    %c0_2 = arith.constant 0 : index
    %2 = vector.load %arg3[%c160, %c0_2] : memref<168x128xf32, #tpu.memory_space<vmem>>, vector<1x128xf32>
    %c161 = arith.constant 161 : index
    %c0_3 = arith.constant 0 : index
    %3 = vector.load %arg3[%c161, %c0_3] : memref<168x128xf32, #tpu.memory_space<vmem>>, vector<1x128xf32>
    %4 = vector.extract_strided_slice %3 {offsets = [0, 0], sizes = [1, 32], strides = [1, 1]} : vector<1x128xf32> to vector<1x32xf32>
    %5 = vector.extract_strided_slice %3 {offsets = [0, 32], sizes = [1, 32], strides = [1, 1]} : vector<1x128xf32> to vector<1x32xf32>
    %6 = vector.extract_strided_slice %3 {offsets = [0, 64], sizes = [1, 32], strides = [1, 1]} : vector<1x128xf32> to vector<1x32xf32>
    %c0_4 = arith.constant 0 : index
    %c0_5 = arith.constant 0 : index
    %7 = vector.load %arg4[%c0_4, %c0_5] : memref<208x64xf32, #tpu.memory_space<vmem>>, vector<64x16xf32>
    %c64 = arith.constant 64 : index
    %c0_6 = arith.constant 0 : index
    %8 = vector.load %arg4[%c64, %c0_6] : memref<208x64xf32, #tpu.memory_space<vmem>>, vector<64x32xf32>
    %c128_7 = arith.constant 128 : index
    %c0_8 = arith.constant 0 : index
    %9 = vector.load %arg4[%c128_7, %c0_8] : memref<208x64xf32, #tpu.memory_space<vmem>>, vector<64x64xf32>
    %c192 = arith.constant 192 : index
    %c0_9 = arith.constant 0 : index
    %10 = vector.load %arg4[%c192, %c0_9] : memref<208x64xf32, #tpu.memory_space<vmem>>, vector<16x64xf32>
    %c0_10 = arith.constant 0 : index
    %c0_11 = arith.constant 0 : index
    %11 = vector.load %arg1[%c0_10, %c0_11] : memref<16x128xf32, #tpu.memory_space<vmem>>, vector<16x128xf32>
    %cst = arith.constant dense<0.000000e+00> : vector<16x128xf32>
    %12 = tpu.matmul %11, %0, %cst {dimension_numbers = #tpu.dot_dimension_numbers<[1], [0], [0], [1], [0, 0, 1, 1], [], []>} : vector<16x128xf32>, vector<128x128xf32>, vector<16x128xf32> -> vector<16x128xf32>
    %13 = vector.broadcast %2 : vector<1x128xf32> to vector<16x128xf32>
    %14 = arith.addf %12, %13 : vector<16x128xf32>
    %15 = vector.extract_strided_slice %14 {offsets = [0, 0], sizes = [16, 32], strides = [1, 1]} : vector<16x128xf32> to vector<16x32xf32>
    %16 = vector.extract_strided_slice %14 {offsets = [0, 32], sizes = [16, 96], strides = [1, 1]} : vector<16x128xf32> to vector<16x96xf32>
    %cst_12 = arith.constant dense<0.000000e+00> : vector<64x96xf32>
    %17 = tpu.matmul %7, %16, %cst_12 {dimension_numbers = #tpu.dot_dimension_numbers<[1], [0], [0], [1], [0, 0, 1, 1], [], []>} : vector<64x16xf32>, vector<16x96xf32>, vector<64x96xf32> -> vector<64x96xf32>
    %18 = vector.extract_strided_slice %17 {offsets = [0, 0], sizes = [64, 32], strides = [1, 1]} : vector<64x96xf32> to vector<64x32xf32>
    %19 = arith.mulf %18, %8 : vector<64x32xf32>
    %20 = vector.extract_strided_slice %17 {offsets = [0, 32], sizes = [64, 32], strides = [1, 1]} : vector<64x96xf32> to vector<64x32xf32>
    %21 = arith.mulf %20, %8 : vector<64x32xf32>
    %22 = vector.extract_strided_slice %17 {offsets = [0, 64], sizes = [64, 32], strides = [1, 1]} : vector<64x96xf32> to vector<64x32xf32>
    %23 = arith.mulf %22, %8 : vector<64x32xf32>
    %24 = vector.broadcast %4 : vector<1x32xf32> to vector<16x32xf32>
    %25 = arith.addf %15, %24 : vector<16x32xf32>
    %26 = vector.broadcast %5 : vector<1x32xf32> to vector<16x32xf32>
    %27 = arith.addf %15, %26 : vector<16x32xf32>
    %cst_13 = arith.constant dense<0.000000e+00> : vector<16x64xf32>
    %28 = tpu.matmul %25, %19, %cst_13 {dimension_numbers = #tpu.dot_dimension_numbers<[1], [1], [0], [0], [0, 0, 1, 0], [], []>} : vector<16x32xf32>, vector<64x32xf32>, vector<16x64xf32> -> vector<16x64xf32>
    %cst_14 = arith.constant dense<0.000000e+00> : vector<16x64xf32>
    %29 = tpu.matmul %27, %23, %cst_14 {dimension_numbers = #tpu.dot_dimension_numbers<[1], [1], [0], [0], [0, 0, 1, 0], [], []>} : vector<16x32xf32>, vector<64x32xf32>, vector<16x64xf32> -> vector<16x64xf32>
    %30 = tpu.iota {dimensions = array<i32: 1>} : vector<16x64xi32>
    %c8_i32 = arith.constant 8 : i32
    %c0_i32 = arith.constant 0 : i32
    %31 = arith.cmpi eq, %c8_i32, %c0_i32 : i32
    %c1_i32 = arith.constant 1 : i32
    %32 = arith.select %31, %c1_i32, %c8_i32 : i32
    %33 = vector.broadcast %32 : i32 to vector<16x64xi32>
    %34 = arith.remsi %30, %33 : vector<16x64xi32>
    %c0_i32_15 = arith.constant 0 : i32
    %35 = vector.broadcast %c0_i32_15 : i32 to vector<16x64xi32>
    %36 = arith.cmpi ne, %34, %35 : vector<16x64xi32>
    %c0_i32_16 = arith.constant 0 : i32
    %37 = vector.broadcast %c0_i32_16 : i32 to vector<16x64xi32>
    %38 = arith.cmpi slt, %34, %37 : vector<16x64xi32>
    %c0_i32_17 = arith.constant 0 : i32
    %39 = arith.cmpi slt, %32, %c0_i32_17 : i32
    %40 = vector.broadcast %39 : i1 to vector<16x64xi1>
    %41 = vector.broadcast %40 : vector<16x64xi1> to vector<16x64xi1>
    %42 = arith.xori %38, %41 : vector<16x64xi1>
    %43 = arith.andi %42, %36 : vector<16x64xi1>
    %44 = vector.broadcast %32 : i32 to vector<16x64xi32>
    %45 = arith.addi %34, %44 : vector<16x64xi32>
    %46 = arith.select %43, %45, %34 : vector<16x64xi1>, vector<16x64xi32>
    %47 = tpu.iota {dimensions = array<i32: 0>} : vector<16x64xi32>
    %c8_i32_18 = arith.constant 8 : i32
    %c0_i32_19 = arith.constant 0 : i32
    %48 = arith.cmpi eq, %c8_i32_18, %c0_i32_19 : i32
    %c1_i32_20 = arith.constant 1 : i32
    %49 = arith.select %48, %c1_i32_20, %c8_i32_18 : i32
    %50 = vector.broadcast %49 : i32 to vector<16x64xi32>
    %51 = arith.remsi %47, %50 : vector<16x64xi32>
    %c0_i32_21 = arith.constant 0 : i32
    %52 = vector.broadcast %c0_i32_21 : i32 to vector<16x64xi32>
    %53 = arith.cmpi ne, %51, %52 : vector<16x64xi32>
    %c0_i32_22 = arith.constant 0 : i32
    %54 = vector.broadcast %c0_i32_22 : i32 to vector<16x64xi32>
    %55 = arith.cmpi slt, %51, %54 : vector<16x64xi32>
    %c0_i32_23 = arith.constant 0 : i32
    %56 = arith.cmpi slt, %49, %c0_i32_23 : i32
    %57 = vector.broadcast %56 : i1 to vector<16x64xi1>
    %58 = vector.broadcast %57 : vector<16x64xi1> to vector<16x64xi1>
    %59 = arith.xori %55, %58 : vector<16x64xi1>
    %60 = arith.andi %59, %53 : vector<16x64xi1>
    %61 = vector.broadcast %49 : i32 to vector<16x64xi32>
    %62 = arith.addi %51, %61 : vector<16x64xi32>
    %63 = arith.select %60, %62, %51 : vector<16x64xi1>, vector<16x64xi32>
    %c15_i32 = arith.constant 15 : i32
    %64 = tpu.dynamic_rotate %29 by %c15_i32 dim 0 : vector<16x64xf32>, i32 -> vector<16x64xf32>
    %cst_24 = arith.constant 0.000000e+00 : f32
    %65 = vector.broadcast %cst_24 : f32 to vector<16x64xf32>
    %c57_i32 = arith.constant 57 : i32
    %66 = tpu.dynamic_rotate %29 by %c57_i32 dim 1 : vector<16x64xf32>, i32 -> vector<16x64xf32>
    %c2_i32 = arith.constant 2 : i32
    %67 = tpu.dynamic_rotate %64 by %c2_i32 dim 1 : vector<16x64xf32>, i32 -> vector<16x64xf32>
    %c0_i32_25 = arith.constant 0 : i32
    %68 = vector.broadcast %c0_i32_25 : i32 to vector<16x64xi32>
    %69 = arith.cmpi sle, %46, %68 : vector<16x64xi32>
    %c1_i32_26 = arith.constant 1 : i32
    %70 = vector.broadcast %c1_i32_26 : i32 to vector<16x64xi32>
    %71 = arith.cmpi eq, %46, %70 : vector<16x64xi32>
    %cst_27 = arith.constant 0.000000e+00 : f32
    %72 = vector.broadcast %cst_27 : f32 to vector<16x64xf32>
    %73 = arith.select %71, %72, %67 : vector<16x64xi1>, vector<16x64xf32>
    %74 = arith.select %69, %66, %73 : vector<16x64xi1>, vector<16x64xf32>
    %c0_i32_28 = arith.constant 0 : i32
    %75 = vector.broadcast %c0_i32_28 : i32 to vector<16x64xi32>
    %76 = arith.cmpi eq, %63, %75 : vector<16x64xi32>
    %77 = arith.select %76, %74, %65 : vector<16x64xi1>, vector<16x64xf32>
    %c58_i32 = arith.constant 58 : i32
    %78 = tpu.dynamic_rotate %29 by %c58_i32 dim 1 : vector<16x64xf32>, i32 -> vector<16x64xf32>
    %c3_i32 = arith.constant 3 : i32
    %79 = tpu.dynamic_rotate %64 by %c3_i32 dim 1 : vector<16x64xf32>, i32 -> vector<16x64xf32>
    %c1_i32_29 = arith.constant 1 : i32
    %80 = vector.broadcast %c1_i32_29 : i32 to vector<16x64xi32>
    %81 = arith.cmpi sle, %46, %80 : vector<16x64xi32>
    %c2_i32_30 = arith.constant 2 : i32
    %82 = vector.broadcast %c2_i32_30 : i32 to vector<16x64xi32>
    %83 = arith.cmpi eq, %46, %82 : vector<16x64xi32>
    %cst_31 = arith.constant 0.000000e+00 : f32
    %84 = vector.broadcast %cst_31 : f32 to vector<16x64xf32>
    %85 = arith.select %83, %84, %79 : vector<16x64xi1>, vector<16x64xf32>
    %86 = arith.select %81, %78, %85 : vector<16x64xi1>, vector<16x64xf32>
    %c1_i32_32 = arith.constant 1 : i32
    %87 = vector.broadcast %c1_i32_32 : i32 to vector<16x64xi32>
    %88 = arith.cmpi eq, %63, %87 : vector<16x64xi32>
    %89 = arith.select %88, %86, %77 : vector<16x64xi1>, vector<16x64xf32>
    %c59_i32 = arith.constant 59 : i32
    %90 = tpu.dynamic_rotate %29 by %c59_i32 dim 1 : vector<16x64xf32>, i32 -> vector<16x64xf32>
    %c4_i32 = arith.constant 4 : i32
    %91 = tpu.dynamic_rotate %64 by %c4_i32 dim 1 : vector<16x64xf32>, i32 -> vector<16x64xf32>
    %c2_i32_33 = arith.constant 2 : i32
    %92 = vector.broadcast %c2_i32_33 : i32 to vector<16x64xi32>
    %93 = arith.cmpi sle, %46, %92 : vector<16x64xi32>
    %c3_i32_34 = arith.constant 3 : i32
    %94 = vector.broadcast %c3_i32_34 : i32 to vector<16x64xi32>
    %95 = arith.cmpi eq, %46, %94 : vector<16x64xi32>
    %cst_35 = arith.constant 0.000000e+00 : f32
    %96 = vector.broadcast %cst_35 : f32 to vector<16x64xf32>
    %97 = arith.select %95, %96, %91 : vector<16x64xi1>, vector<16x64xf32>
    %98 = arith.select %93, %90, %97 : vector<16x64xi1>, vector<16x64xf32>
    %c2_i32_36 = arith.constant 2 : i32
    %99 = vector.broadcast %c2_i32_36 : i32 to vector<16x64xi32>
    %100 = arith.cmpi eq, %63, %99 : vector<16x64xi32>
    %101 = arith.select %100, %98, %89 : vector<16x64xi1>, vector<16x64xf32>
    %c60_i32 = arith.constant 60 : i32
    %102 = tpu.dynamic_rotate %29 by %c60_i32 dim 1 : vector<16x64xf32>, i32 -> vector<16x64xf32>
    %c5_i32 = arith.constant 5 : i32
    %103 = tpu.dynamic_rotate %64 by %c5_i32 dim 1 : vector<16x64xf32>, i32 -> vector<16x64xf32>
    %c3_i32_37 = arith.constant 3 : i32
    %104 = vector.broadcast %c3_i32_37 : i32 to vector<16x64xi32>
    %105 = arith.cmpi sle, %46, %104 : vector<16x64xi32>
    %c4_i32_38 = arith.constant 4 : i32
    %106 = vector.broadcast %c4_i32_38 : i32 to vector<16x64xi32>
    %107 = arith.cmpi eq, %46, %106 : vector<16x64xi32>
    %cst_39 = arith.constant 0.000000e+00 : f32
    %108 = vector.broadcast %cst_39 : f32 to vector<16x64xf32>
    %109 = arith.select %107, %108, %103 : vector<16x64xi1>, vector<16x64xf32>
    %110 = arith.select %105, %102, %109 : vector<16x64xi1>, vector<16x64xf32>
    %c3_i32_40 = arith.constant 3 : i32
    %111 = vector.broadcast %c3_i32_40 : i32 to vector<16x64xi32>
    %112 = arith.cmpi eq, %63, %111 : vector<16x64xi32>
    %113 = arith.select %112, %110, %101 : vector<16x64xi1>, vector<16x64xf32>
    %c61_i32 = arith.constant 61 : i32
    %114 = tpu.dynamic_rotate %29 by %c61_i32 dim 1 : vector<16x64xf32>, i32 -> vector<16x64xf32>
    %c6_i32 = arith.constant 6 : i32
    %115 = tpu.dynamic_rotate %64 by %c6_i32 dim 1 : vector<16x64xf32>, i32 -> vector<16x64xf32>
    %c4_i32_41 = arith.constant 4 : i32
    %116 = vector.broadcast %c4_i32_41 : i32 to vector<16x64xi32>
    %117 = arith.cmpi sle, %46, %116 : vector<16x64xi32>
    %c5_i32_42 = arith.constant 5 : i32
    %118 = vector.broadcast %c5_i32_42 : i32 to vector<16x64xi32>
    %119 = arith.cmpi eq, %46, %118 : vector<16x64xi32>
    %cst_43 = arith.constant 0.000000e+00 : f32
    %120 = vector.broadcast %cst_43 : f32 to vector<16x64xf32>
    %121 = arith.select %119, %120, %115 : vector<16x64xi1>, vector<16x64xf32>
    %122 = arith.select %117, %114, %121 : vector<16x64xi1>, vector<16x64xf32>
    %c4_i32_44 = arith.constant 4 : i32
    %123 = vector.broadcast %c4_i32_44 : i32 to vector<16x64xi32>
    %124 = arith.cmpi eq, %63, %123 : vector<16x64xi32>
    %125 = arith.select %124, %122, %113 : vector<16x64xi1>, vector<16x64xf32>
    %c62_i32 = arith.constant 62 : i32
    %126 = tpu.dynamic_rotate %29 by %c62_i32 dim 1 : vector<16x64xf32>, i32 -> vector<16x64xf32>
    %c7_i32 = arith.constant 7 : i32
    %127 = tpu.dynamic_rotate %64 by %c7_i32 dim 1 : vector<16x64xf32>, i32 -> vector<16x64xf32>
    %c5_i32_45 = arith.constant 5 : i32
    %128 = vector.broadcast %c5_i32_45 : i32 to vector<16x64xi32>
    %129 = arith.cmpi sle, %46, %128 : vector<16x64xi32>
    %c6_i32_46 = arith.constant 6 : i32
    %130 = vector.broadcast %c6_i32_46 : i32 to vector<16x64xi32>
    %131 = arith.cmpi eq, %46, %130 : vector<16x64xi32>
    %cst_47 = arith.constant 0.000000e+00 : f32
    %132 = vector.broadcast %cst_47 : f32 to vector<16x64xf32>
    %133 = arith.select %131, %132, %127 : vector<16x64xi1>, vector<16x64xf32>
    %134 = arith.select %129, %126, %133 : vector<16x64xi1>, vector<16x64xf32>
    %c5_i32_48 = arith.constant 5 : i32
    %135 = vector.broadcast %c5_i32_48 : i32 to vector<16x64xi32>
    %136 = arith.cmpi eq, %63, %135 : vector<16x64xi32>
    %137 = arith.select %136, %134, %125 : vector<16x64xi1>, vector<16x64xf32>
    %c63_i32 = arith.constant 63 : i32
    %138 = tpu.dynamic_rotate %29 by %c63_i32 dim 1 : vector<16x64xf32>, i32 -> vector<16x64xf32>
    %c6_i32_49 = arith.constant 6 : i32
    %139 = vector.broadcast %c6_i32_49 : i32 to vector<16x64xi32>
    %140 = arith.cmpi sle, %46, %139 : vector<16x64xi32>
    %cst_50 = arith.constant 0.000000e+00 : f32
    %141 = vector.broadcast %cst_50 : f32 to vector<16x64xf32>
    %142 = arith.select %140, %138, %141 : vector<16x64xi1>, vector<16x64xf32>
    %c6_i32_51 = arith.constant 6 : i32
    %143 = vector.broadcast %c6_i32_51 : i32 to vector<16x64xi32>
    %144 = arith.cmpi eq, %63, %143 : vector<16x64xi32>
    %145 = arith.select %144, %142, %137 : vector<16x64xi1>, vector<16x64xf32>
    %c7_i32_52 = arith.constant 7 : i32
    %146 = vector.broadcast %c7_i32_52 : i32 to vector<16x64xi32>
    %147 = arith.cmpi sle, %46, %146 : vector<16x64xi32>
    %cst_53 = arith.constant 0.000000e+00 : f32
    %148 = vector.broadcast %cst_53 : f32 to vector<16x64xf32>
    %149 = arith.select %147, %29, %148 : vector<16x64xi1>, vector<16x64xf32>
    %c7_i32_54 = arith.constant 7 : i32
    %150 = vector.broadcast %c7_i32_54 : i32 to vector<16x64xi32>
    %151 = arith.cmpi eq, %63, %150 : vector<16x64xi32>
    %152 = arith.select %151, %149, %145 : vector<16x64xi1>, vector<16x64xf32>
    %c0_55 = arith.constant 0 : index
    %c0_56 = arith.constant 0 : index
    %153 = vector.load %arg2[%c0_55, %c0_56] : memref<16x8xi32, #tpu.memory_space<vmem>>, vector<16x8xi32>
    %154 = tpu.concatenate %153, %153, %153, %153, %153, %153, %153, %153 in 1 : vector<16x8xi32>, vector<16x8xi32>, vector<16x8xi32>, vector<16x8xi32>, vector<16x8xi32>, vector<16x8xi32>, vector<16x8xi32>, vector<16x8xi32> -> vector<16x64xi32>
    %c0_i32_57 = arith.constant 0 : i32
    %155 = vector.broadcast %c0_i32_57 : i32 to vector<16x64xi32>
    %156 = arith.cmpi eq, %154, %155 : vector<16x64xi32>
    %157 = arith.addf %28, %152 : vector<16x64xf32>
    %cst_58 = arith.constant -3.276800e+04 : f32
    %158 = vector.broadcast %cst_58 : f32 to vector<16x64xf32>
    %159 = arith.select %156, %158, %157 : vector<16x64xi1>, vector<16x64xf32>
    %c60_i32_59 = arith.constant 60 : i32
    %160 = tpu.dynamic_rotate %159 by %c60_i32_59 dim 1 : vector<16x64xf32>, i32 -> vector<16x64xf32>
    %161 = arith.maximumf %159, %160 : vector<16x64xf32>
    %c62_i32_60 = arith.constant 62 : i32
    %162 = tpu.dynamic_rotate %161 by %c62_i32_60 dim 1 : vector<16x64xf32>, i32 -> vector<16x64xf32>
    %163 = arith.maximumf %161, %162 : vector<16x64xf32>
    %c63_i32_61 = arith.constant 63 : i32
    %164 = tpu.dynamic_rotate %163 by %c63_i32_61 dim 1 : vector<16x64xf32>, i32 -> vector<16x64xf32>
    %165 = arith.maximumf %163, %164 : vector<16x64xf32>
    %c0_i32_62 = arith.constant 0 : i32
    %166 = vector.broadcast %c0_i32_62 : i32 to vector<16x64xi32>
    %167 = arith.cmpi eq, %46, %166 : vector<16x64xi32>
    %cst_63 = arith.constant 0.000000e+00 : f32
    %168 = vector.broadcast %cst_63 : f32 to vector<16x64xf32>
    %169 = arith.select %167, %165, %168 : vector<16x64xi1>, vector<16x64xf32>
    %cst_64 = arith.constant dense<0.000000e+00> : vector<16x64xf32>
    %170 = tpu.matmul %169, %9, %cst_64 {dimension_numbers = #tpu.dot_dimension_numbers<[1], [0], [0], [1], [0, 0, 1, 1], [], []>} : vector<16x64xf32>, vector<64x64xf32>, vector<16x64xf32> -> vector<16x64xf32>
    %171 = arith.subf %159, %170 : vector<16x64xf32>
    %172 = math.exp %171 : vector<16x64xf32>
    %cst_65 = arith.constant dense<0.000000e+00> : vector<16x64xf32>
    %173 = tpu.matmul %172, %9, %cst_65 {dimension_numbers = #tpu.dot_dimension_numbers<[1], [0], [0], [1], [0, 0, 1, 1], [], []>} : vector<16x64xf32>, vector<64x64xf32>, vector<16x64xf32> -> vector<16x64xf32>
    %174 = tpu.reciprocal %173 : vector<16x64xf32> -> vector<16x64xf32>
    %175 = arith.mulf %172, %174 : vector<16x64xf32>
    %176 = arith.mulf %175, %10 : vector<16x64xf32>
    %c0_66 = arith.constant 0 : index
    %c0_67 = arith.constant 0 : index
    %177 = vector.load %arg6[%c0_66, %c0_67] : memref<16x64xf32, #tpu.memory_space<vmem>>, vector<16x64xf32>
    tpu.vector_store %arg6[%c0_66, %c0_67], %176 {strides = array<i32>} : memref<16x64xf32, #tpu.memory_space<vmem>>, vector<16x64xf32>,
    %cst_68 = arith.constant dense<0.000000e+00> : vector<16x32xf32>
    %178 = tpu.matmul %176, %21, %cst_68 {dimension_numbers = #tpu.dot_dimension_numbers<[1], [0], [0], [1], [0, 0, 1, 1], [], []>} : vector<16x64xf32>, vector<64x32xf32>, vector<16x32xf32> -> vector<16x32xf32>
    %cst_69 = arith.constant dense<0.000000e+00> : vector<16x32xf32>
    %179 = tpu.matmul %178, %1, %cst_69 {dimension_numbers = #tpu.dot_dimension_numbers<[1], [0], [0], [1], [0, 0, 1, 1], [], []>} : vector<16x32xf32>, vector<32x32xf32>, vector<16x32xf32> -> vector<16x32xf32>
    %180 = vector.broadcast %6 : vector<1x32xf32> to vector<16x32xf32>
    %181 = arith.addf %179, %180 : vector<16x32xf32>
    %c0_70 = arith.constant 0 : index
    %c0_71 = arith.constant 0 : index
    %182 = vector.load %arg5[%c0_70, %c0_71] : memref<16x32xf32, #tpu.memory_space<vmem>>, vector<16x32xf32>
    tpu.vector_store %arg5[%c0_70, %c0_71], %181 {strides = array<i32>} : memref<16x32xf32, #tpu.memory_space<vmem>>, vector<16x32xf32>,
    return
  }
  func.func @transform_0(%arg0: i32) -> (i32, i32) {
    %c0_i32 = arith.constant 0 : i32
    %c0_i32_0 = arith.constant 0 : i32
    %c0_i32_1 = arith.constant 0 : i32
    return %c0_i32, %c0_i32_0 : i32, i32
  }
  func.func @transform_1(%arg0: i32) -> (i32, i32) {
    %c0_i32 = arith.constant 0 : i32
    %c0_i32_0 = arith.constant 0 : i32
    %c0_i32_1 = arith.constant 0 : i32
    return %c0_i32, %c0_i32_0 : i32, i32
  }
  func.func @transform_2(%arg0: i32) -> (i32, i32) {
    %c0_i32 = arith.constant 0 : i32
    %c0_i32_0 = arith.constant 0 : i32
    %c0_i32_1 = arith.constant 0 : i32
    return %c0_i32, %c0_i32_0 : i32, i32
  }
  func.func @transform_3(%arg0: i32) -> (i32, i32) {
    %c0_i32 = arith.constant 0 : i32
    %c0_i32_0 = arith.constant 0 : i32
    %c0_i32_1 = arith.constant 0 : i32
    return %c0_i32, %c0_i32_0 : i32, i32
  }
  func.func @transform_4(%arg0: i32) -> (i32, i32) {
    %c0_i32 = arith.constant 0 : i32
    %c0_i32_0 = arith.constant 0 : i32
    %c0_i32_1 = arith.constant 0 : i32
    return %c0_i32, %c0_i32_0 : i32, i32
  }
  func.func @transform_5(%arg0: i32) -> (i32, i32) {
    %c0_i32 = arith.constant 0 : i32
    %c0_i32_0 = arith.constant 0 : i32
    %c0_i32_1 = arith.constant 0 : i32
    return %c0_i32, %c0_i32_0 : i32, i32
  }
}

</mosaic_0001>

<bundles_post_ra>
// kernel: relative_mha.1
= control target key start
LH: loop header
LB: loop body
LE: loop exit
PB: predicated region body
PF: predicated region fallthrough
CT: control target
= control target key end

     0   :  { %s2427_s0 = inlined_call_operand.vmem [shape: f32[16,128], index: 0, kind: input, shape index: {}]   ;;  %s2428_s1 = inlined_call_operand.vmem [shape: s32[16,8], index: 1, kind: input, shape index: {}]   ;;  %s2429_s2 = inlined_call_operand.vmem [shape: f32[168,128], index: 2, kind: input, shape index: {}]   ;;  %s2430_s3 = inlined_call_operand.vmem [shape: f32[208,64], index: 3, kind: input, shape index: {}]   ;;  %s2431_s4 = inlined_call_operand.hbm [shape: f32[16,32], index: 4, kind: output, shape index: {0}]   ;;  %s2432_s5 = inlined_call_operand.vmem [shape: f32[16,64], index: 5, kind: output, shape index: {1}]  }
   0x1   :  { %v35_v0 = vld [vmem:[%s2429_s2 + $0x78] sm:$0xff]  ;;  %v34_v1 = vld [vmem:[%s2429_s2 + $0x70] sm:$0xff]  ;;  %v33_v2 = vld [vmem:[%s2429_s2 + $0x68] sm:$0xff] }
   0x2   :  { %1473 = vmatprep.subr.mxu0 %v35_v0  ;;  %v32_v3 = vld [vmem:[%s2429_s2 + $0x60] sm:$0xff]  ;;  %v31_v5 = vld [vmem:[%s2429_s2 + $0x58] sm:$0xff] }
   0x3   :  { %1474 = vmatpush3.msra.mxu0 %v35_v0  ;;  %v68_v4 = vld [vmem:[%s2427_s0] sm:$0xff] }
   0x4   :  { %1475 = vmatprep.subr.mxu0 %v34_v1  ;;  %1505 = vmatprep.mubr.f32.mxu0 %v68_v4 }
   0x5   :  { %1476 = vmatpush3.msra.mxu0 %v34_v1 }
   0x6   :  { %1477 = vmatprep.subr.mxu0 %v33_v2 }
   0x7   :  { %1478 = vmatpush3.msra.mxu0 %v33_v2 }
   0x8   :  { %11 = vsyncpa [#allocation3], 0  ;;  %1479 = vmatprep.subr.mxu0 %v32_v3  ;;  %v30_v6 = vld [vmem:[%s2429_s2 + $0x50] sm:$0xff]  ;;  %v29_v7 = vld [vmem:[%s2429_s2 + $0x48] sm:$0xff]  ;;  %vm157_vm0 = vcmask 130048   ;;  %vm2435_vm1 = vcmask 261120  }
   0x9   :  { %1480 = vmatpush3.msra.mxu0 %v32_v3  ;;  %v28_v8 = vld [vmem:[%s2429_s2 + $0x40] sm:$0xff]  ;;  %v27_v9 = vld [vmem:[%s2429_s2 + $0x38] sm:$0xff]  ;;  %v26_v10 = vld [vmem:[%s2429_s2 + $0x30] sm:$0xff]  ;;  %s1685_s14 = smov 64   ;;  %s1686_s21 = smov 8   ;;  %vm2433_vm3 = vcmask 1048064  }
   0xa   :  { %1481 = vmatprep.subr.mxu0 %v31_v5  ;;  %v25_v11 = vld [vmem:[%s2429_s2 + $0x28] sm:$0xff]  ;;  %v24_v12 = vld [vmem:[%s2429_s2 + $0x20] sm:$0xff]  ;;  %v23_v13 = vld [vmem:[%s2429_s2 + $0x18] sm:$0xff]  ;;  %s1687_s22 = smov 24   ;;  %s1688_s23 = smov 16   ;;  %vm758_vm4 = vcmask 64512  }
   0xb   :  { %1482 = vmatpush3.msra.mxu0 %v31_v5  ;;  %v22_v14 = vld [vmem:[%s2429_s2 + $0x10] sm:$0xff]  ;;  %v21_v15 = vld [vmem:[%s2429_s2 + $0x8] sm:$0xff]  ;;  %v20_v16 = vld [vmem:[%s2429_s2] sm:$0xff]  ;;  %s1690_s24 = smov 40   ;;  %s1691_s25 = smov 48   ;;  %vm2436_vm5 = vcmask 195584  }
   0xc   :  { %1483 = vmatprep.subr.mxu0 %v30_v6  ;;  %v69_v17 = vld [vmem:[%s2427_s0 + $0x8] sm:$0xff]  ;;  %v42_v18 = vld [vmem:[%s2430_s3] sm:$0xff]  ;;  %s1684_s0 = smov 96   ;;  %v1818_v26 = vld [vmem:[%s2430_s3 + $0x78] sm:$0xff]  ;;  %s1692_s26 = smov 124   ;;  %vm2434_vm6 = vcmask 326656  }
   0xd   :  { %1484 = vmatpush3.msra.mxu0 %v30_v6  ;;  %1512 = vmatprep.mubr.msk.f32.mxu1 %vm157_vm0, %v42_v18  ;;  %v1351_v19 = vld [vmem:[%s2429_s2 + $0xa0] ss:$0 sm:$0xff]  ;;  %v1808_v24 = vld [vmem:[%s2429_s2 + $0xa1] ss:$0 sm:$0xff]  ;;  %v1823_v27 = vld [vmem:[%s2430_s3 + $0x68] sm:$0xff]  ;;  %s1693_s27 = smov 121  }
   0xe   :  { %1485 = vmatprep.subr.mxu0 %v29_v7  ;;  %349 = vrot.lane.b32.xlu1 %v1818_v26, %s1685_s14  ;;  %v1830_v28 = vld [vmem:[%s2430_s3 + $0x70] sm:$0xff]  ;;  %v1837_v29 = vld [vmem:[%s2430_s3 + $0x58] sm:$0xff]  ;;  %v1844_v30 = vld [vmem:[%s2430_s3 + $0x60] sm:$0xff]  ;;  %s1694_s28 = smov 125   ;;  %s1695_s29 = smov 122  }
   0xf   :  { %1486 = vmatpush3.msra.mxu0 %v29_v7  ;;  %v1851_v31 = vld [vmem:[%s2430_s3 + $0x48] sm:$0xff]  ;;  %v1858_v32 = vld [vmem:[%s2430_s3 + $0x50] sm:$0xff]  ;;  %v1867_v33 = vld [vmem:[%s2430_s3 + $0x40] sm:$0xff]  ;;  %s1696_s30 = smov 123   ;;  %s1697_s6 = smov 126  }
  0x10   :  { %1487 = vmatprep.subr.mxu0 %v28_v8  ;;  %v43_v36 = vld [vmem:[%s2430_s3 + $0x8] sm:$0xff]  ;;  %v44_v37 = vld [vmem:[%s2430_s3 + $0x10] sm:$0xff]  ;;  %v45_v38 = vld [vmem:[%s2430_s3 + $0x18] sm:$0xff]  ;;  %s1698_s7 = smov 127   ;;  %s1699_s8 = smov 66  }
  0x11   :  { %1488 = vmatpush3.msra.mxu0 %v28_v8  ;;  %v46_v39 = vld [vmem:[%s2430_s3 + $0x20] sm:$0xff]  ;;  %v47_v40 = vld [vmem:[%s2430_s3 + $0x28] sm:$0xff]  ;;  %v48_v41 = vld [vmem:[%s2430_s3 + $0x30] sm:$0xff]  ;;  %s1700_s9 = smov 67   ;;  %s1701_s10 = smov 68  }
  0x12   :  { %1489 = vmatprep.subr.mxu0 %v27_v9  ;;  %347 = vrot.lane.b32.xlu1 %v1830_v28, %s1685_s14  ;;  %v49_v42 = vld [vmem:[%s2430_s3 + $0x38] sm:$0xff]  ;;  %s1702_s11 = smov 70   ;;  %s1703_s12 = smov 69  }
  0x13   :  { %1490 = vmatpush3.msra.mxu0 %v27_v9  ;;  %s1704_s13 = smov 71   ;;  %s1705_s15 = smov 56  }
  0x14   :  { %1491 = vmatprep.subr.mxu0 %v26_v10 }
  0x15   :  { %1492 = vmatpush3.msra.mxu0 %v26_v10 }
  0x16   :  { %1493 = vmatprep.subr.mxu0 %v25_v11  ;;  %343 = vrot.lane.b32.xlu1 %v1844_v30, %s1685_s14 }
  0x17   :  { %1494 = vmatpush3.msra.mxu0 %v25_v11 }
  0x18   :  { %1495 = vmatprep.subr.mxu0 %v24_v12 }
  0x19   :  { %1496 = vmatpush3.msra.mxu0 %v24_v12 }
  0x1a   :  { %1497 = vmatprep.subr.mxu0 %v23_v13  ;;  %339 = vrot.lane.b32.xlu1 %v1858_v32, %s1685_s14 }
  0x1b   :  { %1498 = vmatpush3.msra.mxu0 %v23_v13 }
  0x1c   :  { %1499 = vmatprep.subr.mxu0 %v22_v14 }
  0x1d   :  { %1500 = vmatpush3.msra.mxu0 %v22_v14 }
  0x1e   :  { %1501 = vmatprep.subr.mxu0 %v21_v15  ;;  %335 = vrot.lane.b32.xlu1 %v1867_v33, %s1685_s14 }
  0x1f   :  { %1502 = vmatpush3.msra.mxu0 %v21_v15 }
  0x20   :  { %1503 = vmatprep.subr.mxu0 %v20_v16 }
  0x21   :  { %1504 = vmatpush3.msra.mxu0 %v20_v16 }
  0x22   :  { %1506 = vmatmul.mubr.f32.vlgmr.msra.gmra.mxu0 %v69_v17 }
  0x80   :  { %v350_v43 = vpop.permute.xlu1 %349 }
  0x84   :  { %v348_v47 = vpop.permute.xlu1 %347 }
  0x88   :  { %v344_v52 = vpop.permute.xlu1 %343 }
  0x8c   :  { %v340_v61 = vpop.permute.xlu1 %339 }
  0x90   :  { %v336_v4 = vpop.permute.xlu1 %335 }
  0xe2   :  { %v1507_v20 = vpop.f32.mrf.mxu0 }
  0xe3   :  { %v1799_v21 = vadd.f32 %v1507_v20, %v1351_v19 }
  0xe4   :  { %v140_v22 = vpop.f32.mrf.mxu0 }
  0xe5   :  { %v1801_v23 = vadd.f32 %v1351_v19, %v140_v22  ;;  %153 = vrot.lane.b32.xlu0 %v1799_v21, %s1684_s0  ;;  %v372_v11 = vadd.f32 %v1808_v24, %v1799_v21 }
  0xe7   :  { %v371_v25 = vadd.f32 %v1808_v24, %v1801_v23 }
  0xe9   :  { %151 = vrot.lane.b32.xlu0 %v1801_v23, %s1684_s0  ;;  %1559 = vmatprep.mubr.msk.f32.mxu0 %vm2435_vm1, %v371_v25  ;;  %v501_v25 = vlaneseq }
  0xed   :  { %345 = vrot.lane.b32.xlu0 %v1823_v27, %s1685_s14 }
  0xf1   :  { %341 = vrot.lane.b32.xlu0 %v1837_v29, %s1685_s14 }
  0xf5   :  { %337 = vrot.lane.b32.xlu0 %v1851_v31, %s1685_s14 }
 0x157   :  { %v154_v34 = vpop.permute.xlu0 %153 }
 0x158   :  { %1508 = vmatprep.subr.mxu1 %v154_v34 }
 0x159   :  { %1509 = vmatpush3.msra.mxu1 %v154_v34  ;;  %v1989_v34 = vshrl.u32 %v501_v25, 7 }
 0x15b   :  { %v152_v35 = vpop.permute.xlu0 %151  ;;  %vm544_vm2 = vcmp.lt.s32.totalorder %v1989_v34, 7 }
 0x15c   :  { %1510 = vmatprep.subr.mxu1 %v152_v35 }
 0x15d   :  { %1511 = vmatpush3.msra.mxu1 %v152_v35 }
 0x15e   :  { %1513 = vmatmul.mubr.msk.f32.vlgmr.msra.gmra.mxu1 %vm157_vm0, %v43_v36 }
 0x15f   :  { %1515 = vmatprep.mubr.msk.f32.mxu1 %vm157_vm0, %v44_v37  ;;  %v346_v50 = vpop.permute.xlu0 %345 }
 0x162   :  { %1516 = vmatmul.mubr.msk.f32.gmra.mxu1 %vm157_vm0, %v45_v38 }
 0x163   :  { %1518 = vmatprep.mubr.msk.f32.mxu1 %vm157_vm0, %v46_v39  ;;  %v342_v59 = vpop.permute.xlu0 %341  ;;  %v2009_v39 = vld [vmem:[%s2428_s1 + $0x8] sm:$0xff] }
 0x166   :  { %1519 = vmatmul.mubr.msk.f32.gmra.mxu1 %vm157_vm0, %v47_v40 }
 0x167   :  { %1521 = vmatprep.mubr.msk.f32.mxu1 %vm157_vm0, %v48_v41  ;;  %v338_v1 = vpop.permute.xlu0 %337  ;;  %v2018_v41 = vld [vmem:[%s2428_s1] sm:$0xff]  ;;  %s1689_s1 = smov 32  }
 0x16a   :  { %1522 = vmatmul.mubr.msk.f32.gmra.mxu1 %vm157_vm0, %v49_v42 }
 0x21e   :  { %v1899_v44 = vpop.f32.mrf.mxu1 }
 0x21f   :  { %v360_v5 = vmul.f32 %v1899_v44, %v338_v1  ;;  %v288_v9 = vmul.f32 %v1899_v44, %v1851_v31 }
 0x220   :  { %v1901_v45 = vpop.f32.mrf.mxu1 }
 0x221   :  { %v359_v6 = vmul.f32 %v336_v4, %v1901_v45  ;;  %v287_v10 = vmul.f32 %v1901_v45, %v1867_v33 }
 0x222   :  { %v1903_v46 = vpop.f32.mrf.mxu1 }
 0x223   :  { %v362_v0 = vmul.f32 %v1903_v46, %v342_v59  ;;  %v290_v7 = vmul.f32 %v1903_v46, %v1837_v29 }
 0x224   :  { %v1905_v48 = vpop.f32.mrf.mxu1 }
 0x225   :  { %v361_v2 = vmul.f32 %v340_v61, %v1905_v48  ;;  %v289_v8 = vmul.f32 %v1905_v48, %v1858_v32 }
 0x226   :  { %v1907_v49 = vpop.f32.mrf.mxu1 }
 0x227   :  { %v364_v60 = vmul.f32 %v1907_v49, %v346_v50  ;;  %v292_v62 = vmul.f32 %v1907_v49, %v1823_v27 }
 0x228   :  { %v1909_v51 = vpop.f32.mrf.mxu1 }
 0x229   :  { %v363_v63 = vmul.f32 %v344_v52, %v1909_v51  ;;  %v291_v3 = vmul.f32 %v1909_v51, %v1844_v30 }
 0x22a   :  { %v1911_v53 = vpop.f32.mrf.mxu1 }
 0x22b   :  { %v294_v54 = vmul.f32 %v1911_v53, %v1818_v26  ;;  %v366_v55 = vmul.f32 %v1911_v53, %v350_v43 }
 0x22c   :  { %v1916_v56 = vpop.f32.mrf.mxu1 }
 0x22d   :  { %v293_v57 = vmul.f32 %v1916_v56, %v1830_v28  ;;  %v365_v58 = vmul.f32 %v348_v47, %v1916_v56  ;;  %401 = vrot.lane.b32.xlu0 %v366_v55, %s1685_s14  ;;  %1543 = vmatprep.subr.msk.mxu0 %vm2435_vm1, %v294_v54 }
 0x22e   :  { %1544 = vmatpush3.xpose.msk.msra.mxu0 %vm2435_vm1, %v294_v54 }
 0x22f   :  { %399 = vrot.lane.b32.xlu1 %v365_v58, %s1685_s14  ;;  %1545 = vmatprep.subr.msk.mxu0 %vm2435_vm1, %v293_v57 }
 0x231   :  { %397 = vrot.lane.b32.xlu0 %v364_v60, %s1685_s14 }
 0x232   :  { %1546 = vmatpush3.xpose.msk.msra.mxu0 %vm2435_vm1, %v293_v57 }
 0x233   :  { %395 = vrot.lane.b32.xlu1 %v363_v63, %s1685_s14  ;;  %1547 = vmatprep.subr.msk.mxu0 %vm2435_vm1, %v292_v62 }
 0x235   :  { %393 = vrot.lane.b32.xlu0 %v362_v0, %s1685_s14 }
 0x236   :  { %1548 = vmatpush3.xpose.msk.msra.mxu0 %vm2435_vm1, %v292_v62 }
 0x237   :  { %391 = vrot.lane.b32.xlu1 %v361_v2, %s1685_s14  ;;  %1549 = vmatprep.subr.msk.mxu0 %vm2435_vm1, %v291_v3 }
 0x239   :  { %389 = vrot.lane.b32.xlu0 %v360_v5, %s1685_s14 }
 0x23a   :  { %1550 = vmatpush3.xpose.msk.msra.mxu0 %vm2435_vm1, %v291_v3 }
 0x23b   :  { %387 = vrot.lane.b32.xlu1 %v359_v6, %s1685_s14  ;;  %1551 = vmatprep.subr.msk.mxu0 %vm2435_vm1, %v290_v7 }
 0x23d   :  { %374 = vrot.lane.b32.xlu0 %v1808_v24, %s1684_s0 }
 0x23e   :  { %1552 = vmatpush3.xpose.msk.msra.mxu0 %vm2435_vm1, %v290_v7 }
 0x23f   :  { %1553 = vmatprep.subr.msk.mxu0 %vm2435_vm1, %v289_v8 }
 0x242   :  { %1554 = vmatpush3.xpose.msk.msra.mxu0 %vm2435_vm1, %v289_v8 }
 0x243   :  { %1555 = vmatprep.subr.msk.mxu0 %vm2435_vm1, %v288_v9 }
 0x246   :  { %1556 = vmatpush3.xpose.msk.msra.mxu0 %vm2435_vm1, %v288_v9 }
 0x247   :  { %1557 = vmatprep.subr.msk.mxu0 %vm2435_vm1, %v287_v10 }
 0x24a   :  { %1558 = vmatpush3.xpose.msk.msra.mxu0 %vm2435_vm1, %v287_v10 }
 0x24d   :  { %1560 = vmatmul.mubr.msk.f32.vlgmr.msra.gmra.mxu0 %vm2435_vm1, %v372_v11 }
 0x29f   :  { %v402_v12 = vpop.permute.xlu0 %401 }
 0x2a0   :  { %1524 = vmatprep.subr.msk.mxu1 %vm2435_vm1, %v402_v12 }
 0x2a1   :  { %v400_v13 = vpop.permute.xlu1 %399  ;;  %1525 = vmatpush3.xpose.msk.msra.mxu1 %vm2435_vm1, %v402_v12 }
 0x2a2   :  { %1526 = vmatprep.subr.msk.mxu1 %vm2435_vm1, %v400_v13 }
 0x2a3   :  { %v398_v14 = vpop.permute.xlu0 %397 }
 0x2a5   :  { %1527 = vmatpush3.xpose.msk.msra.mxu1 %vm2435_vm1, %v400_v13  ;;  %v396_v16 = vpop.permute.xlu1 %395 }
 0x2a6   :  { %1528 = vmatprep.subr.msk.mxu1 %vm2435_vm1, %v398_v14 }
 0x2a7   :  { %v394_v15 = vpop.permute.xlu0 %393 }
 0x2a9   :  { %1529 = vmatpush3.xpose.msk.msra.mxu1 %vm2435_vm1, %v398_v14  ;;  %v392_v20 = vpop.permute.xlu1 %391 }
 0x2aa   :  { %1530 = vmatprep.subr.msk.mxu1 %vm2435_vm1, %v396_v16 }
 0x2ab   :  { %v390_v17 = vpop.permute.xlu0 %389 }
 0x2ad   :  { %1531 = vmatpush3.xpose.msk.msra.mxu1 %vm2435_vm1, %v396_v16  ;;  %v388_v22 = vpop.permute.xlu1 %387 }
 0x2ae   :  { %1532 = vmatprep.subr.msk.mxu1 %vm2435_vm1, %v394_v15 }
 0x2af   :  { %v375_v18 = vpop.permute.xlu0 %374 }
 0x2b0   :  { %v377_v19 = vadd.f32 %v375_v18, %v1801_v23  ;;  %v378_v23 = vadd.f32 %v375_v18, %v1799_v21 }
 0x2b1   :  { %1533 = vmatpush3.xpose.msk.msra.mxu1 %vm2435_vm1, %v394_v15 }
 0x2b2   :  { %1534 = vmatprep.subr.msk.mxu1 %vm2435_vm1, %v392_v20  ;;  %1540 = vmatprep.mubr.msk.f32.mxu1 %vm2435_vm1, %v377_v19 }
 0x2b5   :  { %1535 = vmatpush3.xpose.msk.msra.mxu1 %vm2435_vm1, %v392_v20 }
 0x2b6   :  { %1536 = vmatprep.subr.msk.mxu1 %vm2435_vm1, %v390_v17 }
 0x2b9   :  { %1537 = vmatpush3.xpose.msk.msra.mxu1 %vm2435_vm1, %v390_v17 }
 0x2ba   :  { %1538 = vmatprep.subr.msk.mxu1 %vm2435_vm1, %v388_v22 }
 0x2bd   :  { %1539 = vmatpush3.xpose.msk.msra.mxu1 %vm2435_vm1, %v388_v22 }
 0x2c0   :  { %1541 = vmatmul.mubr.msk.f32.vlgmr.msra.gmra.mxu1 %vm2435_vm1, %v378_v23 }
 0x380   :  { %v1991_v35 = vpop.f32.mrf.mxu1 }
 0x381   :  { %v543_v38 = vrot.slane %v1991_v35, 1 }
 0x382   :  { %v1993_v36 = vpop.f32.mrf.mxu1 }
 0x383   :  { %548 = vrot.lane.b32.xlu0 %v1993_v36, %s1685_s14  ;;  %v542_v37 = vrot.slane %v1993_v36, 1 }
 0x385   :  { %v2000_v21 = vsel %vm544_vm2, %v542_v37, %v543_v38  ;;  %v2011_v40 = vsel %vm544_vm2, %v543_v38, %v542_v37 }
 0x386   :  { %560 = vrot.lane.b32.xlu1 %v2000_v21, %s1685_s14 }
 0x387   :  { %551 = vrot.lane.b32.xlu0 %v1991_v35, %s1685_s14 }
 0x38a   :  { %563 = vrot.lane.b32.xlu1 %v2011_v40, %s1685_s14 }
 0x38b   :  { %732 = vrot.lane.b32.xlu0 %v2009_v39, %s1686_s21 }
 0x38e   :  { %730 = vrot.lane.b32.xlu1 %v2018_v41, %s1686_s21 }
 0x38f   :  { %738 = vrot.lane.b32.xlu0 %v2018_v41, %s1687_s22 }
 0x392   :  { %734 = vrot.lane.b32.xlu1 %v2018_v41, %s1688_s23 }
 0x396   :  { %736 = vrot.lane.b32.xlu1 %v2009_v39, %s1688_s23 }
 0x3f5   :  { %v549_v42 = vpop.permute.xlu0 %548 }
 0x3f6   :  { %v550_v57 = vsel %vm2433_vm3, %v549_v42, %v1993_v36 }
 0x3f8   :  { %v561_v43 = vpop.permute.xlu1 %560 }
 0x3f9   :  { %v552_v47 = vpop.permute.xlu0 %551  ;;  %v562_v50 = vsel %vm2433_vm3, %v561_v43, %v2000_v21  ;;  %v517_v43 = vadd.s32 8, %v1989_v34 }
 0x3fa   :  { %566 = vrot.lane.b32.xlu1 %v562_v50, %s1685_s14  ;;  %v553_v52 = vsel %vm2433_vm3, %v552_v47, %v1991_v35 }
 0x3fb   :  { %556 = vrot.lane.b32.xlu0 %v553_v52, %s1685_s14  ;;  %v502_v52 = vand.u32 127, %v501_v25 }
 0x3fc   :  { %v564_v54 = vpop.permute.xlu1 %563 }
 0x3fd   :  { %v565_v55 = vsel %vm2433_vm3, %v564_v54, %v2011_v40  ;;  %v2053_v62 = vpop.permute.xlu0 %732  ;;  %v2105_v54 = vand.u32 7, %v517_v43 }
 0x3fe   :  { %568 = vrot.lane.b32.xlu1 %v565_v55, %s1685_s14  ;;  %v760_v55 = vsel %vm758_vm4, %v2009_v39, %v2053_v62 }
 0x3ff   :  { %554 = vrot.lane.b32.xlu0 %v550_v57, %s1685_s14  ;;  %vm595_vm9 = vcmp.eq.s32.totalorder %v2105_v54, 0  ;;  %vm617_vm12 = vcmp.eq.s32.totalorder %v2105_v54, 1  ;;  %vm639_vm15 = vcmp.eq.s32.totalorder %v2105_v54, 2 }
 0x400   :  { %v731_v58 = vpop.permute.xlu1 %730 }
 0x401   :  { %v759_v59 = vsel %vm758_vm4, %v2018_v41, %v731_v58  ;;  %v2055_v63 = vpop.permute.xlu0 %738 }
 0x402   :  { %740 = vrot.lane.b32.xlu1 %v2009_v39, %s1687_s22 }
 0x403   :  { %742 = vrot.lane.b32.xlu0 %v2018_v41, %s1689_s1 }
 0x404   :  { %v735_v60 = vpop.permute.xlu1 %734 }
 0x405   :  { %v2045_v61 = vsel %vm157_vm0, %v759_v59, %v735_v60  ;;  %v2112_v59 = vand.u32 7, %v502_v52  ;;  %v2115_v60 = vand.u32 7, %v1989_v34 }
 0x406   :  { %746 = vrot.lane.b32.xlu1 %v2018_v41, %s1690_s24  ;;  %v764_v25 = vsel %vm2436_vm5, %v2045_v61, %v2055_v63  ;;  %vm771_vm5 = vcmask 392192  }
 0x407   :  { %744 = vrot.lane.b32.xlu0 %v2009_v39, %s1689_s1  ;;  %vm572_vm7 = vcmp.le.s32.totalorder %v2112_v59, 0  ;;  %vm573_vm8 = vcmp.eq.s32.totalorder %v2112_v59, 1  ;;  %vm599_vm10 = vcmp.eq.s32.totalorder %v2112_v59, 2  ;;  %vm598_vm11 = vcmp.le.s32.totalorder %v2112_v59, 1 }
 0x408   :  { %v2060_v3 = vpop.permute.xlu1 %736  ;;  %vm620_vm13 = vcmp.le.s32.totalorder %v2112_v59, 2  ;;  %vm621_vm14 = vcmp.eq.s32.totalorder %v2112_v59, 3  ;;  %vm616_vm2 = vcmp.eq.s32.totalorder %v2115_v60, 1  ;;  %vm664_vm4 = vcmp.le.s32.totalorder %v2112_v59, 4 }
 0x40a   :  { %750 = vrot.lane.b32.xlu1 %v2018_v41, %s1691_s25 }
 0x40b   :  { %748 = vrot.lane.b32.xlu0 %v2009_v39, %s1690_s24 }
 0x46c   :  { %v567_v5 = vpop.permute.xlu1 %566 }
 0x46d   :  { %v557_v0 = vpop.permute.xlu0 %556  ;;  %v570_v8 = vsel %vm2433_vm3, %v567_v5, %v2000_v21 }
 0x46e   :  { %v559_v1 = vsel %vm2433_vm3, %v557_v0, %v1991_v35  ;;  %v2122_v0 = vsel %vm157_vm0, %v760_v55, %v2060_v3  ;;  %vm594_vm0 = vcmp.eq.s32.totalorder %v2115_v60, 0 }
 0x46f   :  { %654 = vrot.lane.b32.xlu0 %v559_v1, %s1692_s26  ;;  %588 = vrot.lane.b32.xlu1 %v559_v1, %s1693_s27 }
 0x470   :  { %v569_v6 = vpop.permute.xlu1 %568 }
 0x471   :  { %v555_v2 = vpop.permute.xlu0 %554  ;;  %v571_v7 = vsel %vm2433_vm3, %v569_v6, %v2011_v40 }
 0x472   :  { %v558_v4 = vsel %vm2433_vm3, %v555_v2, %v1993_v36  ;;  %vm686_vm3 = vcmp.le.s32.totalorder %v2112_v59, 5 }
 0x473   :  { %676 = vrot.lane.b32.xlu0 %v559_v1, %s1694_s28  ;;  %610 = vrot.lane.b32.xlu1 %v559_v1, %s1695_s29 }
 0x474   :  { %v2077_v9 = vpop.permute.xlu1 %740 }
 0x475   :  { %v743_v10 = vpop.permute.xlu0 %742 }
 0x477   :  { %674 = vrot.lane.b32.xlu0 %v558_v4, %s1694_s28  ;;  %632 = vrot.lane.b32.xlu1 %v559_v1, %s1696_s30 }
 0x478   :  { %v747_v11 = vpop.permute.xlu1 %746 }
 0x479   :  { %v2079_v12 = vpop.permute.xlu0 %744 }
 0x47b   :  { %696 = vrot.lane.b32.xlu0 %v558_v4, %s1697_s6  ;;  %698 = vrot.lane.b32.xlu1 %v559_v1, %s1697_s6 }
 0x47c   :  { %v2081_v13 = vpop.permute.xlu1 %750 }
 0x47d   :  { %v2083_v14 = vpop.permute.xlu0 %748 }
 0x47f   :  { %709 = vrot.lane.b32.xlu0 %v558_v4, %s1698_s7  ;;  %711 = vrot.lane.b32.xlu1 %v559_v1, %s1698_s7  ;;  %v766_v1 = vsel %vm2435_vm1, %v764_v25, %v743_v10  ;;  %vm687_vm1 = vcmp.eq.s32.totalorder %v2112_v59, 6 }
 0x483   :  { %586 = vrot.lane.b32.xlu1 %v558_v4, %s1693_s27  ;;  %578 = vrot.lane.b32.xlu0 %v571_v7, %s1699_s8 }
 0x487   :  { %608 = vrot.lane.b32.xlu1 %v558_v4, %s1695_s29  ;;  %600 = vrot.lane.b32.xlu0 %v570_v8, %s1700_s9 }
 0x48b   :  { %630 = vrot.lane.b32.xlu1 %v558_v4, %s1696_s30  ;;  %602 = vrot.lane.b32.xlu0 %v571_v7, %s1700_s9 }
 0x48f   :  { %652 = vrot.lane.b32.xlu1 %v558_v4, %s1692_s26  ;;  %622 = vrot.lane.b32.xlu0 %v570_v8, %s1701_s10 }
 0x493   :  { %576 = vrot.lane.b32.xlu1 %v570_v8, %s1699_s8  ;;  %624 = vrot.lane.b32.xlu0 %v571_v7, %s1701_s10 }
 0x497   :  { %668 = vrot.lane.b32.xlu1 %v571_v7, %s1702_s11  ;;  %644 = vrot.lane.b32.xlu0 %v570_v8, %s1703_s12 }
 0x49b   :  { %688 = vrot.lane.b32.xlu1 %v570_v8, %s1704_s13  ;;  %646 = vrot.lane.b32.xlu0 %v571_v7, %s1703_s12 }
 0x49f   :  { %690 = vrot.lane.b32.xlu1 %v571_v7, %s1704_s13  ;;  %666 = vrot.lane.b32.xlu0 %v570_v8, %s1702_s11 }
 0x4a3   :  { %754 = vrot.lane.b32.xlu1 %v2018_v41, %s1705_s15  ;;  %752 = vrot.lane.b32.xlu0 %v2009_v39, %s1691_s25 }
 0x4a7   :  { %756 = vrot.lane.b32.xlu0 %v2009_v39, %s1705_s15  ;;  %v2128_v39 = vsel %vm2434_vm6, %v766_v1, %v747_v11  ;;  %vm665_vm6 = vcmp.eq.s32.totalorder %v2112_v59, 5 }
 0x4e1   :  { %v2085_v15 = vpop.permute.xlu0 %654  ;;  %v589_v16 = vpop.permute.xlu1 %588 }
 0x4e5   :  { %v2087_v17 = vpop.permute.xlu0 %676  ;;  %v611_v18 = vpop.permute.xlu1 %610 }
 0x4e9   :  { %v2089_v19 = vpop.permute.xlu0 %674  ;;  %v2091_v20 = vpop.permute.xlu1 %632 }
 0x4ed   :  { %v2093_v22 = vpop.permute.xlu0 %696  ;;  %v2095_v23 = vpop.permute.xlu1 %698 }
 0x4f1   :  { %v2097_v37 = vpop.permute.xlu0 %709  ;;  %v2099_v38 = vpop.permute.xlu1 %711 }
 0x4f5   :  { %v579_v21 = vpop.permute.xlu0 %578  ;;  %v587_v40 = vpop.permute.xlu1 %586 }
 0x4f6   :  { %v583_v63 = vsel %vm573_vm8, 0.0, %v579_v21 }
 0x4f7   :  { %v593_v8 = vsel %vm572_vm7, %v589_v16, %v583_v63 }
 0x4f9   :  { %v601_v41 = vpop.permute.xlu0 %600  ;;  %v609_v42 = vpop.permute.xlu1 %608 }
 0x4fa   :  { %v606_v4 = vsel %vm599_vm10, 0.0, %v601_v41 }
 0x4fb   :  { %v614_v21 = vsel %vm598_vm11, %v609_v42, %v606_v4  ;;  %v1561_v4 = vpop.f32.mrf.mxu0 }
 0x4fd   :  { %v603_v47 = vpop.permute.xlu0 %602  ;;  %v2102_v50 = vpop.permute.xlu1 %630 }
 0x4fe   :  { %v607_v3 = vsel %vm599_vm10, 0.0, %v603_v47  ;;  %vm661_vm10 = vcmp.eq.s32.totalorder %v2105_v54, 3 }
 0x4ff   :  { %v615_v11 = vsel %vm598_vm11, %v611_v18, %v607_v3  ;;  %v597_v18 = vsel %vm595_vm9, %v593_v8, 0.0  ;;  %vm704_vm11 = vcmp.eq.s32.totalorder %v2115_v60, 5  ;;  %vm705_vm9 = vcmp.eq.s32.totalorder %v2105_v54, 5 }
 0x500   :  { %v619_v52 = vsel %vm617_vm12, %v615_v11, %v597_v18  ;;  %vm2437_vm12 = vcmp.le.s32.totalorder %v2112_v59, 3 }
 0x501   :  { %v623_v57 = vpop.permute.xlu0 %622  ;;  %v2110_v58 = vpop.permute.xlu1 %652 }
 0x502   :  { %v628_v16 = vsel %vm621_vm14, 0.0, %v623_v57 }
 0x503   :  { %v636_v55 = vsel %vm620_vm13, %v2102_v50, %v628_v16 }
 0x505   :  { %v625_v34 = vpop.permute.xlu0 %624  ;;  %v577_v61 = vpop.permute.xlu1 %576 }
 0x506   :  { %v582_v62 = vsel %vm573_vm8, 0.0, %v577_v61  ;;  %v629_v5 = vsel %vm621_vm14, 0.0, %v625_v34  ;;  %vm643_vm8 = vcmp.eq.s32.totalorder %v2112_v59, 4  ;;  %vm683_vm14 = vcmp.eq.s32.totalorder %v2105_v54, 4 }
 0x507   :  { %v592_v2 = vsel %vm572_vm7, %v587_v40, %v582_v62  ;;  %v637_v40 = vsel %vm620_vm13, %v2091_v20, %v629_v5  ;;  %vm682_vm7 = vcmp.eq.s32.totalorder %v2115_v60, 4  ;;  %vm718_vm13 = vcmp.eq.s32.totalorder %v2105_v54, 6 }
 0x508   :  { %v596_v10 = vsel %vm594_vm0, %v592_v2, 0.0  ;;  %v641_v57 = vsel %vm639_vm15, %v637_v40, %v619_v52  ;;  %vm2438_vm0 = vcmp.eq.s32.totalorder %v2115_v60, 2  ;;  %vm717_vm15 = vcmp.eq.s32.totalorder %v2115_v60, 6 }
 0x509   :  { %v645_v6 = vpop.permute.xlu0 %644  ;;  %v669_v7 = vpop.permute.xlu1 %668  ;;  %v618_v41 = vsel %vm616_vm2, %v614_v21, %v596_v10  ;;  %vm2439_vm2 = vmmov %vm2437_vm12  ;;  %v772_v21 = vsel %vm771_vm5, %v2128_v39, %v2081_v13 }
 0x50a   :  { %v650_v43 = vsel %vm643_vm8, 0.0, %v645_v6  ;;  %v673_v25 = vsel %vm665_vm6, 0.0, %v669_v7  ;;  %v640_v34 = vsel %vm2438_vm0, %v636_v55, %v618_v41  ;;  %vm2440_vm0 = vcmp.eq.s32.totalorder %v2115_v60, 3  ;;  %v875_v39 = vpop.f32.mrf.mxu0 }
 0x50b   :  { %v658_v61 = vsel %vm2439_vm2, %v2110_v58, %v650_v43 }
 0x50c   :  { %v662_v5 = vsel %vm2440_vm0, %v658_v61, %v640_v34 }
 0x50d   :  { %v647_v47 = vpop.permute.xlu0 %646  ;;  %v689_v42 = vpop.permute.xlu1 %688 }
 0x50e   :  { %v651_v20 = vsel %vm643_vm8, 0.0, %v647_v47  ;;  %v694_v62 = vsel %vm687_vm1, 0.0, %v689_v42  ;;  %vm774_vm8 = vcmask 457728  }
 0x50f   :  { %v659_v1 = vsel %vm2437_vm12, %v2085_v15, %v651_v20  ;;  %vm725_vm12 = vcmp.eq.s32.totalorder %v2105_v54, 7  ;;  %v681_v15 = vsel %vm664_vm4, %v2087_v17, %v673_v25  ;;  %v702_v10 = vsel %vm686_vm3, %v2093_v22, %v694_v62 }
 0x510   :  { %v663_v50 = vsel %vm661_vm10, %v659_v1, %v641_v57  ;;  %vm724_vm10 = vcmp.eq.s32.totalorder %v2115_v60, 7 }
 0x511   :  { %v667_v63 = vpop.permute.xlu0 %666  ;;  %v691_v2 = vpop.permute.xlu1 %690  ;;  %v685_v7 = vsel %vm683_vm14, %v681_v15, %v663_v50 }
 0x512   :  { %v672_v58 = vsel %vm665_vm6, 0.0, %v667_v63  ;;  %v695_v3 = vsel %vm687_vm1, 0.0, %v691_v2  ;;  %vm2441_vm1 = vcmp.le.s32.totalorder %v2112_v59, 6 }
 0x513   :  { %v680_v6 = vsel %vm664_vm4, %v2089_v19, %v672_v58  ;;  %v703_v17 = vsel %vm686_vm3, %v2095_v23, %v695_v3  ;;  %v716_v8 = vsel %vm2441_vm1, %v2099_v38, 0.0  ;;  %vm2442_vm6 = vmmov %vm2441_vm1  ;;  %vm2443_vm3 = vcmask 195584  }
 0x514   :  { %v684_v11 = vsel %vm682_vm7, %v680_v6, %v662_v5  ;;  %v707_v19 = vsel %vm705_vm9, %v703_v17, %v685_v7  ;;  %v715_v23 = vsel %vm2442_vm6, %v2097_v37, 0.0  ;;  %v765_v18 = vsel %vm2443_vm3, %v2122_v0, %v2077_v9 }
 0x515   :  { %v706_v38 = vsel %vm704_vm11, %v702_v10, %v684_v11  ;;  %v720_v22 = vsel %vm718_vm13, %v716_v8, %v707_v19  ;;  %v753_v16 = vpop.permute.xlu0 %752  ;;  %v755_v40 = vpop.permute.xlu1 %754  ;;  %vm2444_vm4 = vcmask 261120   ;;  %vm2445_vm7 = vcmask 326656  }
 0x516   :  { %v719_v41 = vsel %vm717_vm15, %v715_v23, %v706_v38  ;;  %v775_v13 = vsel %vm774_vm8, %v772_v21, %v755_v40  ;;  %v767_v37 = vsel %vm2444_vm4, %v765_v18, %v2079_v12  ;;  %v727_v47 = vsel %vm725_vm12, %v1991_v35, %v720_v22  ;;  %v65_v22 = vld [vmem:[%s2430_s3 + $0xb8] sm:$0xff]  ;;  %v63_v40 = vld [vmem:[%s2430_s3 + $0xa8] sm:$0xff]  ;;  %v62_v18 = vld [vmem:[%s2430_s3 + $0xa0] sm:$0xff] }
 0x517   :  { %v726_v43 = vsel %vm724_vm10, %v1993_v36, %v719_v41  ;;  %v770_v9 = vsel %vm2445_vm7, %v767_v37, %v2083_v14  ;;  %vm777_vm11 = vcmp.eq.s32.totalorder %v775_v13, 0  ;;  %v881_v55 = vadd.f32 %v1561_v4, %v727_v47  ;;  %1562 = vmatprep.subr.mxu1 %v65_v22  ;;  %v2313_v41 = vld [vmem:[%s2430_s3 + $0x98] sm:$0xff]  ;;  %v2318_v13 = vld [vmem:[%s2430_s3 + $0x90] sm:$0xff]  ;;  %v2334_v37 = vld [vmem:[%s2430_s3 + $0x80] sm:$0xff] }
 0x518   :  { %v876_v0 = vadd.f32 %v875_v39, %v726_v43  ;;  %v773_v42 = vsel %vm771_vm5, %v770_v9, %v753_v16  ;;  %vm2446_vm9 = vcmask 1048064   ;;  %v64_v16 = vld [vmem:[%s2430_s3 + $0xb0] sm:$0xff]  ;;  %1563 = vmatpush3.msra.mxu1 %v65_v22  ;;  %v2327_v39 = vld [vmem:[%s2430_s3 + $0x88] sm:$0xff]  ;;  %vm952_vm4 = vcmp.eq.s32.totalorder %v2112_v59, 0 }
 0x519   :  { %v757_v52 = vpop.permute.xlu0 %756  ;;  %vm2447_vm5 = vmmov %vm2446_vm9  ;;  %1564 = vmatprep.subr.mxu1 %v64_v16  ;;  %vm955_vm7 = vcmask 523264  }
 0x51a   :  { %v2259_v20 = vsel %vm777_vm11, -32768.0, %v876_v0  ;;  %v776_v12 = vsel %vm774_vm8, %v773_v42, %v757_v52  ;;  %vm2448_vm2 = vmmov %vm2447_vm5  ;;  %1565 = vmatpush3.msra.mxu1 %v64_v16  ;;  %vm2458_vm11 = vcmask 261120  }
 0x51b   :  { %vm778_vm14 = vcmp.eq.s32.totalorder %v776_v12, 0  ;;  %886 = vrot.lane.b32.xlu1 %v2259_v20, %s1685_s14  ;;  %vm2449_vm13 = vmmov %vm2448_vm2  ;;  %1566 = vmatprep.subr.mxu1 %v63_v40 }
 0x51c   :  { %v2264_v36 = vsel %vm778_vm14, -32768.0, %v881_v55  ;;  %vm2450_vm15 = vmmov %vm2448_vm2  ;;  %1567 = vmatpush3.msra.mxu1 %v63_v40 }
 0x51d   :  { %889 = vrot.lane.b32.xlu0 %v2264_v36, %s1685_s14  ;;  %vm2451_vm8 = vmmov %vm2448_vm2  ;;  %1568 = vmatprep.subr.mxu1 %v62_v18 }
 0x51e   :  { %vm2452_vm12 = vmmov %vm2448_vm2  ;;  %1569 = vmatpush3.msra.mxu1 %v62_v18 }
 0x51f   :  { %vm2453_vm10 = vmmov %vm2448_vm2  ;;  %1570 = vmatprep.subr.mxu1 %v2313_v41 }
 0x520   :  { %vm2454_vm0 = vmmov %vm2448_vm2  ;;  %1571 = vmatpush3.msra.mxu1 %v2313_v41 }
 0x521   :  { %vm2455_vm1 = vmmov %vm2454_vm0  ;;  %1572 = vmatprep.subr.mxu1 %v2318_v13 }
 0x522   :  { %1573 = vmatpush3.msra.mxu1 %v2318_v13  ;;  %vm2456_vm6 = vmmov %vm2454_vm0 }
 0x523   :  { %1574 = vmatprep.subr.mxu1 %v2327_v39  ;;  %vm2457_vm3 = vmmov %vm2454_vm0 }
 0x524   :  { %1575 = vmatpush3.msra.mxu1 %v2327_v39  ;;  %vm2459_vm14 = vmmov %vm2458_vm11 }
 0x525   :  { %1576 = vmatprep.subr.mxu1 %v2334_v37 }
 0x526   :  { %1577 = vmatpush3.msra.mxu1 %v2334_v37 }
 0x527   :  { %1581 = vmatprep.subr.mxu1 %v65_v22 }
 0x58d   :  { %v887_v35 = vpop.permute.xlu1 %886 }
 0x58e   :  { %v888_v14 = vsel %vm2446_vm9, %v887_v35, %v2259_v20  ;;  %vm2460_vm9 = vmmov %vm2458_vm11 }
 0x58f   :  { %v890_v54 = vpop.permute.xlu0 %889  ;;  %892 = vrot.lane.b32.xlu1 %v888_v14, %s1685_s14 }
 0x590   :  { %v891_v60 = vsel %vm2447_vm5, %v890_v54, %v2264_v36  ;;  %vm2461_vm5 = vmmov %vm2460_vm9 }
 0x591   :  { %894 = vrot.lane.b32.xlu0 %v891_v60, %s1685_s14 }
 0x601   :  { %v893_v57 = vpop.permute.xlu1 %892 }
 0x602   :  { %v896_v25 = vsel %vm2448_vm2, %v893_v57, %v2259_v20 }
 0x603   :  { %v895_v1 = vpop.permute.xlu0 %894  ;;  %900 = vrot.lane.b32.xlu1 %v896_v25, %s1692_s26 }
 0x604   :  { %v897_v34 = vsel %vm2449_vm13, %v895_v1, %v2264_v36 }
 0x605   :  { %902 = vrot.lane.b32.xlu0 %v897_v34, %s1692_s26 }
 0x675   :  { %v901_v61 = vpop.permute.xlu1 %900 }
 0x676   :  { %v906_v50 = vmax.f32 %v2259_v20, %v901_v61 }
 0x677   :  { %v903_v62 = vpop.permute.xlu0 %902 }
 0x678   :  { %v907_v63 = vmax.f32 %v2264_v36, %v903_v62  ;;  %908 = vrot.lane.b32.xlu1 %v906_v50, %s1685_s14 }
 0x67a   :  { %911 = vrot.lane.b32.xlu0 %v907_v63, %s1685_s14 }
 0x6ea   :  { %v909_v2 = vpop.permute.xlu1 %908 }
 0x6eb   :  { %v910_v15 = vsel %vm2450_vm15, %v909_v2, %v906_v50 }
 0x6ec   :  { %v912_v58 = vpop.permute.xlu0 %911  ;;  %914 = vrot.lane.b32.xlu1 %v910_v15, %s1685_s14 }
 0x6ed   :  { %v913_v3 = vsel %vm2451_vm8, %v912_v58, %v907_v63 }
 0x6ee   :  { %916 = vrot.lane.b32.xlu0 %v913_v3, %s1685_s14 }
 0x75e   :  { %v915_v4 = vpop.permute.xlu1 %914 }
 0x75f   :  { %v918_v5 = vsel %vm2452_vm12, %v915_v4, %v906_v50  ;;  %v39_v4 = vld [vmem:[%s2429_s2 + $0x98] sm:$0xff] }
 0x760   :  { %v917_v6 = vpop.permute.xlu0 %916  ;;  %922 = vrot.lane.b32.xlu1 %v918_v5, %s1697_s6 }
 0x761   :  { %v919_v7 = vsel %vm2453_vm10, %v917_v6, %v907_v63 }
 0x762   :  { %924 = vrot.lane.b32.xlu0 %v919_v7, %s1697_s6  ;;  %v67_v7 = vld [vmem:[%s2430_s3 + $0xc8] sm:$0xff] }
 0x7d2   :  { %v923_v17 = vpop.permute.xlu1 %922 }
 0x7d3   :  { %v928_v8 = vmax.f32 %v906_v50, %v923_v17 }
 0x7d4   :  { %v925_v10 = vpop.permute.xlu0 %924 }
 0x7d5   :  { %v929_v11 = vmax.f32 %v907_v63, %v925_v10  ;;  %930 = vrot.lane.b32.xlu1 %v928_v8, %s1685_s14  ;;  %v66_v10 = vld [vmem:[%s2430_s3 + $0xc0] sm:$0xff] }
 0x7d7   :  { %933 = vrot.lane.b32.xlu0 %v929_v11, %s1685_s14 }
 0x847   :  { %v931_v19 = vpop.permute.xlu1 %930 }
 0x848   :  { %v932_v21 = vsel %vm2454_vm0, %v931_v19, %v928_v8 }
 0x849   :  { %v934_v23 = vpop.permute.xlu0 %933  ;;  %936 = vrot.lane.b32.xlu1 %v932_v21, %s1685_s14 }
 0x84a   :  { %v935_v38 = vsel %vm2455_vm1, %v934_v23, %v929_v11  ;;  %v37_v23 = vld [vmem:[%s2429_s2 + $0x88] sm:$0xff] }
 0x84b   :  { %938 = vrot.lane.b32.xlu0 %v935_v38, %s1685_s14  ;;  %v36_v38 = vld [vmem:[%s2429_s2 + $0x80] sm:$0xff] }
 0x8bb   :  { %v937_v43 = vpop.permute.xlu1 %936 }
 0x8bc   :  { %v940_v47 = vsel %vm2456_vm6, %v937_v43, %v928_v8 }
 0x8bd   :  { %v939_v9 = vpop.permute.xlu0 %938  ;;  %944 = vrot.lane.b32.xlu1 %v940_v47, %s1698_s7 }
 0x8be   :  { %v941_v0 = vsel %vm2457_vm3, %v939_v9, %v929_v11 }
 0x8bf   :  { %946 = vrot.lane.b32.xlu0 %v941_v0, %s1698_s7 }
 0x8c1   :  { %317 = vrot.lane.b32.xlu1 %v1818_v26, %s1689_s1 }
 0x8c3   :  { %315 = vrot.lane.b32.xlu0 %v1830_v28, %s1689_s1 }
 0x8c5   :  { %313 = vrot.lane.b32.xlu1 %v1823_v27, %s1689_s1 }
 0x8c7   :  { %311 = vrot.lane.b32.xlu0 %v1844_v30, %s1689_s1 }
 0x8c9   :  { %309 = vrot.lane.b32.xlu1 %v1837_v29, %s1689_s1 }
 0x8cb   :  { %307 = vrot.lane.b32.xlu0 %v1858_v32, %s1689_s1 }
 0x8cd   :  { %305 = vrot.lane.b32.xlu1 %v1851_v31, %s1689_s1 }
 0x8cf   :  { %303 = vrot.lane.b32.xlu0 %v1867_v33, %s1689_s1 }
 0x92f   :  { %v945_v26 = vpop.permute.xlu1 %944 }
 0x930   :  { %v950_v28 = vmax.f32 %v928_v8, %v945_v26 }
 0x931   :  { %v947_v27 = vpop.permute.xlu0 %946 }
 0x932   :  { %v953_v42 = vsel %vm952_vm4, %v950_v28, 0.0  ;;  %v951_v30 = vmax.f32 %v929_v11, %v947_v27 }
 0x933   :  { %1578 = vmatprep.mubr.msk.f32.mxu1 %vm955_vm7, %v953_v42  ;;  %v318_v29 = vpop.permute.xlu1 %317 }
 0x934   :  { %v954_v52 = vsel %vm952_vm4, %v951_v30, 0.0  ;;  %v334_v32 = vmul.f32 %v1911_v53, %v318_v29 }
 0x935   :  { %v316_v12 = vpop.permute.xlu0 %315  ;;  %1579 = vmatmul.mubr.msk.f32.vlgmr.msra.gmra.mxu1 %vm955_vm7, %v954_v52 }
 0x936   :  { %v333_v31 = vmul.f32 %v316_v12, %v1916_v56  ;;  %1154 = vrot.lane.b32.xlu1 %v334_v32, %s1684_s0  ;;  %1582 = vmatpush3.msra.mxu1 %v65_v22 }
 0x937   :  { %v314_v33 = vpop.permute.xlu1 %313  ;;  %1583 = vmatprep.subr.mxu1 %v64_v16 }
 0x938   :  { %v332_v59 = vmul.f32 %v1907_v49, %v314_v33  ;;  %1152 = vrot.lane.b32.xlu0 %v333_v31, %s1684_s0  ;;  %1584 = vmatpush3.msra.mxu1 %v64_v16 }
 0x939   :  { %v312_v55 = vpop.permute.xlu0 %311  ;;  %1585 = vmatprep.subr.mxu1 %v63_v40 }
 0x93a   :  { %v331_v35 = vmul.f32 %v312_v55, %v1909_v51  ;;  %1150 = vrot.lane.b32.xlu1 %v332_v59, %s1684_s0  ;;  %1586 = vmatpush3.msra.mxu1 %v63_v40 }
 0x93b   :  { %v310_v53 = vpop.permute.xlu1 %309  ;;  %1587 = vmatprep.subr.mxu1 %v62_v18 }
 0x93c   :  { %v330_v56 = vmul.f32 %v1903_v46, %v310_v53  ;;  %1148 = vrot.lane.b32.xlu0 %v331_v35, %s1684_s0  ;;  %1588 = vmatpush3.msra.mxu1 %v62_v18 }
 0x93d   :  { %v308_v14 = vpop.permute.xlu0 %307  ;;  %1589 = vmatprep.subr.mxu1 %v2313_v41 }
 0x93e   :  { %v329_v49 = vmul.f32 %v308_v14, %v1905_v48  ;;  %1146 = vrot.lane.b32.xlu1 %v330_v56, %s1684_s0  ;;  %1590 = vmatpush3.msra.mxu1 %v2313_v41 }
 0x93f   :  { %v306_v51 = vpop.permute.xlu1 %305  ;;  %1591 = vmatprep.subr.mxu1 %v2318_v13 }
 0x940   :  { %v328_v54 = vmul.f32 %v1899_v44, %v306_v51  ;;  %1144 = vrot.lane.b32.xlu0 %v329_v49, %s1684_s0  ;;  %1592 = vmatpush3.msra.mxu1 %v2318_v13 }
 0x941   :  { %v304_v46 = vpop.permute.xlu0 %303  ;;  %1593 = vmatprep.subr.mxu1 %v2327_v39 }
 0x942   :  { %v327_v60 = vmul.f32 %v304_v46, %v1901_v45  ;;  %1142 = vrot.lane.b32.xlu1 %v328_v54, %s1684_s0  ;;  %1594 = vmatpush3.msra.mxu1 %v2327_v39 }
 0x943   :  { %1595 = vmatprep.subr.mxu1 %v2334_v37 }
 0x944   :  { %1140 = vrot.lane.b32.xlu0 %v327_v60, %s1684_s0  ;;  %1596 = vmatpush3.msra.mxu1 %v2334_v37 }
 0x945   :  { %1619 = vmatprep.subr.mxu1 %v39_v4 }
 0x946   :  { %1245 = vrot.lane.b32.xlu1 %v1808_v24, %s1685_s14 }
 0x9a8   :  { %v1155_v44 = vpop.permute.xlu1 %1154 }
 0x9a9   :  { %1600 = vmatprep.subr.mxu0 %v1155_v44 }
 0x9aa   :  { %v1153_v48 = vpop.permute.xlu0 %1152  ;;  %1601 = vmatpush3.msra.mxu0 %v1155_v44 }
 0x9ab   :  { %1602 = vmatprep.subr.mxu0 %v1153_v48 }
 0x9ac   :  { %1603 = vmatpush3.msra.mxu0 %v1153_v48  ;;  %v1151_v45 = vpop.permute.xlu1 %1150 }
 0x9ad   :  { %1604 = vmatprep.subr.mxu0 %v1151_v45 }
 0x9ae   :  { %v1149_v57 = vpop.permute.xlu0 %1148  ;;  %1605 = vmatpush3.msra.mxu0 %v1151_v45 }
 0x9af   :  { %1606 = vmatprep.subr.mxu0 %v1149_v57 }
 0x9b0   :  { %1607 = vmatpush3.msra.mxu0 %v1149_v57  ;;  %v1147_v25 = vpop.permute.xlu1 %1146 }
 0x9b1   :  { %1608 = vmatprep.subr.mxu0 %v1147_v25 }
 0x9b2   :  { %v1145_v1 = vpop.permute.xlu0 %1144  ;;  %1609 = vmatpush3.msra.mxu0 %v1147_v25 }
 0x9b3   :  { %1610 = vmatprep.subr.mxu0 %v1145_v1 }
 0x9b4   :  { %1611 = vmatpush3.msra.mxu0 %v1145_v1  ;;  %v1143_v34 = vpop.permute.xlu1 %1142 }
 0x9b5   :  { %1612 = vmatprep.subr.mxu0 %v1143_v34 }
 0x9b6   :  { %v1141_v24 = vpop.permute.xlu0 %1140  ;;  %1613 = vmatpush3.msra.mxu0 %v1143_v34 }
 0x9b7   :  { %1614 = vmatprep.subr.mxu0 %v1141_v24 }
 0x9b8   :  { %1615 = vmatpush3.msra.mxu0 %v1141_v24  ;;  %v1246_v40 = vpop.permute.xlu1 %1245 }
 0x9f5   :  { %v1580_v61 = vpop.f32.mrf.mxu1 }
 0x9f6   :  { %v1038_v50 = vsub.f32 %v2264_v36, %v1580_v61  ;;  %v38_v36 = vld [vmem:[%s2429_s2 + $0x90] sm:$0xff] }
 0x9f7   :  { %v1028_v62 = vpop.f32.mrf.mxu1 }
 0x9f8   :  { %v1037_v63 = vsub.f32 %v2259_v20, %v1028_v62  ;;  %v1041_v2 = vmul.f32 1.442695, %v1038_v50 }
 0x9fa   :  { %v1039_v15 = vmul.f32 1.442695, %v1037_v63 }
 0x9fc   :  { %1654 = vpow2.f32 %v1039_v15 }
 0x9fd   :  { %1656 = vpow2.f32 %v1041_v2 }
 0xa09   :  { %v1655_v58 = vpop.eup %1654 }
 0xa0a   :  { %v1657_v3 = vpop.eup %1656  ;;  %1597 = vmatprep.mubr.msk.f32.mxu1 %vm955_vm7, %v1655_v58 }
 0xa0b   :  { %1598 = vmatmul.mubr.msk.f32.vlgmr.msra.gmra.mxu1 %vm955_vm7, %v1657_v3 }
 0xa0c   :  { %1620 = vmatpush3.msra.mxu1 %v39_v4 }
 0xa0d   :  { %1621 = vmatprep.subr.mxu1 %v38_v36 }
 0xa0e   :  { %1622 = vmatpush3.msra.mxu1 %v38_v36 }
 0xa0f   :  { %1623 = vmatprep.subr.mxu1 %v37_v23 }
 0xa10   :  { %1624 = vmatpush3.msra.mxu1 %v37_v23 }
 0xa11   :  { %1625 = vmatprep.subr.mxu1 %v36_v38 }
 0xa12   :  { %1626 = vmatpush3.msra.mxu1 %v36_v38 }
 0xacb   :  { %v1599_v20 = vpop.f32.mrf.mxu1 }
 0xacc   :  { %1658 = vrcp.f32 %v1599_v20 }
 0xacd   :  { %v1115_v5 = vpop.f32.mrf.mxu1 }
 0xace   :  { %1660 = vrcp.f32 %v1115_v5 }
 0xad9   :  { %v1659_v6 = vpop.eup %1658 }
 0xada   :  { %v1127_v17 = vmul.f32 %v1659_v6, %v1657_v3 }
 0xadb   :  { %v1661_v8 = vpop.eup %1660 }
 0xadc   :  { %v1126_v11 = vmul.f32 %v1661_v8, %v1655_v58  ;;  %v1129_v19 = vmul.f32 %v1127_v17, %v67_v7 }
 0xade   :  { %v1128_v21 = vmul.f32 %v1126_v11, %v66_v10  ;;  %1131 = vst.msk [vmem:[%s2432_s5 + $0x8] sm:$0xff] %vm955_vm7, %v1129_v19 }
 0xae0   :  { %1130 = vst.msk [vmem:[%s2432_s5] sm:$0xff] %vm955_vm7, %v1128_v21  ;;  %1616 = vmatprep.mubr.msk.f32.mxu0 %vm955_vm7, %v1128_v21  ;;  %s1706_s5 = smov [#allocation2]  }
 0xae1   :  { %1617 = vmatmul.mubr.msk.f32.vlgmr.msra.gmra.mxu0 %vm955_vm7, %v1129_v19  ;;  %s1336_s22 = sshll.u32 %s1706_s5, 4  ;;  %s1337_s22 = int_to_ptr.vmem [resolvable:$true] %s1336_s22 }
 0xae2   :  { %s1662_s2 = scalar_lea.vmem %s1337_s22, 256  ;;  %p1667_p1 = scmp.lt.s32.totalorder %s1337_s22, %s1337_s22 }
 0xae3   :  { %p1663_p0 = scmp.ne.s32.totalorder %s1337_s22, %s1662_s2  ;;  %p1668_p2 = scmp.lt.s32.totalorder %s1662_s2, %s1662_s2 }
 0xae5   :  { %p1669_p3 = por %p1668_p2, %p1667_p1 }
 0xae7   :  { %p1670_p4 = pnand %p1669_p3, %p1663_p0 }
 0xba1   :  { %v1618_v22 = vpop.f32.mrf.mxu0 }
 0xba3   :  { %v1236_v16 = vpop.f32.mrf.mxu0 }
 0xba4   :  { %1627 = vmatprep.mubr.msk.f32.mxu1 %vm2458_vm11, %v1236_v16 }
 0xba5   :  { %1628 = vmatmul.mubr.msk.f32.vlgmr.msra.gmra.mxu1 %vm2459_vm14, %v1618_v22 }
 0xc65   :  { %v1629_v18 = vpop.f32.mrf.mxu1 }
 0xc66   :  { %v1326_v41 = vadd.f32 %v1629_v18, %v1246_v40 }
 0xc67   :  { %v1320_v13 = vpop.f32.mrf.mxu1 }
 0xc68   :  { %1330 = vst.msk [vmem:[#allocation2 + $0x8] sm:$0xff] %vm2460_vm9, %v1326_v41  ;;  %v1321_v39 = vadd.f32 %v1320_v13, %v1246_v40 }
 0xc6a   :  { %1329 = vst.msk [vmem:[#allocation2] sm:$0xff] %vm2461_vm5, %v1321_v39 }
 0xc6b   :  { %1673 = shalt.err (!%p1670_p4)
}
 0xc6c   :  { %s1707_s23 = smov 128  }
 0xc6d   :  { %1342 = dma.vmem_to_hbm [thread:$0]  %s1337_s22, 256, %s2431_s4, [#allocation3], %s1707_s23, %s1707_s23, %s1686_s21  }
 0xc6e   :  { %1682 = dma.done.wait [#allocation3], 256  }
 0xc6f   :  { %1683 = vsyncadd [#allocation3], 4294967040 }
 0xc70   :  { %1350 = vsyncpa [#allocation3], 1 }

</bundles_post_ra>
